<compile_context>
chip_gen: v7x
topology: tpu7x:2x2x1
jax: 0.10.0
libtpu: 0.0.40
codegen_flags: <defaults>
</compile_context>

<pallas_src>
import functools

import jax
import jax.numpy as jnp
from jax import lax
from jax.experimental import pallas as pl
from jax.experimental.pallas import tpu as pltpu


def _basic_block_kernel(x_ref, w1_ref, s1_ref, b1_ref, w2_ref, s2_ref, b2_ref,
                        out_ref, xrp_ref, *, H, W, C, P, TH):
    # x_ref  : (1, H, W, C)   bf16   whole image of this batch element
    # w1_ref : (3, 3C, P)     bf16   conv1 weights, [dy, (dx-major, cin), cout]
    # s1/b1  : (1, P)         f32    folded BN1 scale / bias
    # w2_ref : (3, 3P, P)     bf16   conv2 weights
    # s2/b2  : (1, P)         f32    folded BN2 scale / bias
    # out_ref: (1, TH, W, P)  f32    TH output rows of this batch element
    # xrp_ref: (H+4, W, C)    bf16   row-padded input scratch (persists over t)
    t = pl.program_id(1)
    R0 = pl.multiple_of(t * TH, TH)          # first output row of this tile

    # Build the row-padded input once per batch element; zero only the halo rows.
    @pl.when(t == 0)
    def _():
        zrows = jnp.zeros((2, W, C), dtype=xrp_ref.dtype)
        xrp_ref[0:2] = zrows
        xrp_ref[H + 2:H + 4] = zrows
        xrp_ref[2:H + 2] = x_ref[0]

    def width_taps(rows):
        # rows: (A, W, cin) f32 -> (A, W, 3*cin) = [left | centre | right] taps
        a, _, cin = rows.shape
        zc = jnp.zeros((a, 1, cin), dtype=rows.dtype)
        left = jnp.concatenate([zc, rows[:, :W - 1, :]], axis=1)
        right = jnp.concatenate([rows[:, 1:, :], zc], axis=1)
        return jnp.concatenate([left, rows, right], axis=-1)

    # ---- conv1 (+ BN1 + ReLU) on TH+2 rows (1-row halo for conv2) ------------
    # Extended h1 rows r = R0-1 .. R0+TH need input rows R0-2 .. R0+TH+1,
    # i.e. xrp rows R0 .. R0+TH+3 (xrp row j == image row j-2).
    xr = xrp_ref[pl.ds(R0, TH + 4)].astype(jnp.float32)        # (TH+4, W, C)
    xcat = width_taps(xr).astype(jnp.bfloat16)                 # (TH+4, W, 3C)

    acc = jnp.zeros(((TH + 2) * W, P), jnp.float32)
    for dy in range(3):
        patch = xcat[dy:dy + TH + 2].reshape((TH + 2) * W, 3 * C)
        acc = acc + jnp.dot(patch, w1_ref[dy],
                            preferred_element_type=jnp.float32)

    h1 = jnp.maximum(acc * s1_ref[...] + b1_ref[...], 0.0)     # f32
    h1 = h1.reshape(TH + 2, W, P)

    # h1 rows that fall outside the image act as conv2's zero padding.
    e = lax.broadcasted_iota(jnp.int32, (TH + 2, 1, 1), 0)
    r = R0 - 1 + e
    h1 = jnp.where((r >= 0) & (r < H), h1, 0.0)

    # ---- conv2 (+ BN2 + residual + ReLU) on TH rows --------------------------
    hcat = width_taps(h1).astype(jnp.bfloat16)                 # (TH+2, W, 3P)

    acc2 = jnp.zeros((TH * W, P), jnp.float32)
    for dy in range(3):
        patch = hcat[dy:dy + TH].reshape(TH * W, 3 * P)
        acc2 = acc2 + jnp.dot(patch, w2_ref[dy],
                              preferred_element_type=jnp.float32)

    ident = xrp_ref[pl.ds(R0 + 2, TH)].astype(jnp.float32).reshape(TH * W, C)
    out = acc2 * s2_ref[...] + b2_ref[...] + ident
    out_ref[0] = jnp.maximum(out, 0.0).reshape(TH, W, P).astype(out_ref.dtype)


def basic_block_forward(x_nchw, params, eps=1e-5, row_tile=8):
    """BasicBlock forward. x_nchw: (N, C, H, W) float32. Returns NCHW float32."""
    (w1_oihw, g1, be1, m1, v1, w2_oihw, g2, be2, m2, v2) = params
    N, C, H, W = x_nchw.shape
    P = w1_oihw.shape[0]
    assert P == C, "identity residual requires inplanes == planes (no downsample)"
    TH = row_tile if H % row_tile == 0 else H

    # Layout glue: NCHW -> NHWC (channels on lanes), bf16 activations for the MXU.
    x = jnp.transpose(x_nchw, (0, 2, 3, 1)).astype(jnp.bfloat16)

    # OIHW -> (ky, kx*cin, cout): dx-major K blocks matching the in-kernel concat.
    w1 = jnp.transpose(w1_oihw, (2, 3, 1, 0)).reshape(3, 3 * C, P).astype(jnp.bfloat16)
    w2 = jnp.transpose(w2_oihw, (2, 3, 1, 0)).reshape(3, 3 * P, P).astype(jnp.bfloat16)

    # Fold inference-mode BatchNorm into per-channel scale/bias (kept in f32).
    s1 = (g1 / jnp.sqrt(v1 + eps)).reshape(1, P)
    b1 = (be1 - m1 * g1 / jnp.sqrt(v1 + eps)).reshape(1, P)
    s2 = (g2 / jnp.sqrt(v2 + eps)).reshape(1, P)
    b2 = (be2 - m2 * g2 / jnp.sqrt(v2 + eps)).reshape(1, P)

    kernel = functools.partial(_basic_block_kernel, H=H, W=W, C=C, P=P, TH=TH)

    out_nhwc = pl.pallas_call(
        kernel,
        out_shape=jax.ShapeDtypeStruct((N, H, W, P), jnp.float32),
        grid_spec=pltpu.PrefetchScalarGridSpec(
            num_scalar_prefetch=0,
            grid=(N, H // TH),
            in_specs=[
                pl.BlockSpec((1, H, W, C), lambda n, t: (n, 0, 0, 0)),
                pl.BlockSpec((3, 3 * C, P), lambda n, t: (0, 0, 0)),
                pl.BlockSpec((1, P), lambda n, t: (0, 0)),
                pl.BlockSpec((1, P), lambda n, t: (0, 0)),
                pl.BlockSpec((3, 3 * P, P), lambda n, t: (0, 0, 0)),
                pl.BlockSpec((1, P), lambda n, t: (0, 0)),
                pl.BlockSpec((1, P), lambda n, t: (0, 0)),
            ],
            out_specs=pl.BlockSpec((1, TH, W, P), lambda n, t: (n, t, 0, 0)),
            scratch_shapes=[pltpu.VMEM((H + 4, W, C), jnp.bfloat16)],
        ),
        compiler_params=pltpu.CompilerParams(
            dimension_semantics=("parallel", "arbitrary"),
            vmem_limit_bytes=32 * 1024 * 1024),
    )(x, w1, s1, b1, w2, s2, b2)

    return jnp.transpose(out_nhwc, (0, 3, 1, 2))  # back to NCHW


def ref_forward(x_nchw, params, eps=1e-5, round_like_kernel=False):
    """Pure-JAX reference (PyTorch module in eval mode). If round_like_kernel,
    applies the same bf16 roundings the kernel uses (matmul operands only)."""
    (w1, g1, be1, m1, v1, w2, g2, be2, m2, v2) = params

    def rnd(a):
        return a.astype(jnp.bfloat16).astype(jnp.float32) if round_like_kernel else a

    def conv(x, w):
        return lax.conv_general_dilated(
            x, w, window_strides=(1, 1), padding=((1, 1), (1, 1)),
            dimension_numbers=("NCHW", "OIHW", "NCHW"),
            precision=lax.Precision.HIGHEST)

    def bn(y, g, b, m, v):
        g, b, m, v = (t[None, :, None, None] for t in (g, b, m, v))
        return (y - m) / jnp.sqrt(v + eps) * g + b

    xr = rnd(x_nchw)
    out = jax.nn.relu(bn(conv(xr, rnd(w1)), g1, be1, m1, v1))
    out = bn(conv(rnd(out), rnd(w2)), g2, be2, m2, v2) + xr
    return jax.nn.relu(out)


if __name__ == "__main__":
    # Small shapes: inplanes = planes = 4, spatial 16x16, batch 2.
    N, C, H, W = 2, 4, 16, 16
    P = C  # planes == inplanes, stride 1, downsample = None

    key = jax.random.PRNGKey(0)
    ks = jax.random.split(key, 11)
    x = jax.random.normal(ks[0], (N, C, H, W), jnp.float32)

    w1 = jax.random.normal(ks[1], (P, C, 3, 3), jnp.float32) * 0.1
    g1 = 1.0 + 0.1 * jax.random.normal(ks[2], (P,), jnp.float32)
    be1 = 0.1 * jax.random.normal(ks[3], (P,), jnp.float32)
    m1 = 0.1 * jax.random.normal(ks[4], (P,), jnp.float32)
    v1 = jnp.abs(jax.random.normal(ks[5], (P,), jnp.float32)) + 0.5

    w2 = jax.random.normal(ks[6], (P, P, 3, 3), jnp.float32) * 0.1
    g2 = 1.0 + 0.1 * jax.random.normal(ks[7], (P,), jnp.float32)
    be2 = 0.1 * jax.random.normal(ks[8], (P,), jnp.float32)
    m2 = 0.1 * jax.random.normal(ks[9], (P,), jnp.float32)
    v2 = jnp.abs(jax.random.normal(ks[10], (P,), jnp.float32)) + 0.5

    params = (w1, g1, be1, m1, v1, w2, g2, be2, m2, v2)

    out = jax.block_until_ready(jax.jit(basic_block_forward)(x, params))
    assert out.shape == (N, C, H, W)

    # Tight check against a reference that applies the same bf16 roundings.
    ref_b = jax.block_until_ready(ref_forward(x, params, round_like_kernel=True))
    err_b = float(jnp.max(jnp.abs(out - ref_b)))
    assert jnp.allclose(out, ref_b, atol=2e-3, rtol=2e-3), err_b

    # Loose sanity check against the full-f32 reference.
    ref_f = jax.block_until_ready(ref_forward(x, params))
    err_f = float(jnp.max(jnp.abs(out - ref_f)))
    assert err_f < 1e-1, err_f

    print("KERNEL_OK")
</pallas_src>

<mosaic_0001>
module attributes {stable_mosaic.version = 11 : i64} {
  func.func @_basic_block_kernel(%arg0: i32, %arg1: i32, %arg2: memref<1x16x16x4xbf16, #tpu.memory_space<vmem>>, %arg3: memref<3x12x4xbf16, #tpu.memory_space<vmem>>, %arg4: memref<1x4xf32, #tpu.memory_space<vmem>>, %arg5: memref<1x4xf32, #tpu.memory_space<vmem>>, %arg6: memref<3x12x4xbf16, #tpu.memory_space<vmem>>, %arg7: memref<1x4xf32, #tpu.memory_space<vmem>>, %arg8: memref<1x4xf32, #tpu.memory_space<vmem>>, %arg9: memref<1x8x16x4xf32, #tpu.memory_space<vmem>>, %arg10: memref<20x16x4xbf16, #tpu.memory_space<vmem>>) attributes {dimension_semantics = [#tpu.dimension_semantics<parallel>, #tpu.dimension_semantics<arbitrary>], iteration_bounds = array<i64: 2, 2>, scalar_prefetch = 0 : i64, scratch_operands = 1 : i64, tpu.core_type = #tpu.core_type<tc>, window_params = [{transform_indices = @transform_0, window_bounds = array<i64: 1, 16, 16, 4>}, {pipeline_mode = #tpu.pipeline_mode<synchronous>, transform_indices = @transform_1, window_bounds = array<i64: 3, 12, 4>}, {pipeline_mode = #tpu.pipeline_mode<synchronous>, transform_indices = @transform_2, window_bounds = array<i64: 1, 4>}, {pipeline_mode = #tpu.pipeline_mode<synchronous>, transform_indices = @transform_3, window_bounds = array<i64: 1, 4>}, {pipeline_mode = #tpu.pipeline_mode<synchronous>, transform_indices = @transform_4, window_bounds = array<i64: 3, 12, 4>}, {pipeline_mode = #tpu.pipeline_mode<synchronous>, transform_indices = @transform_5, window_bounds = array<i64: 1, 4>}, {pipeline_mode = #tpu.pipeline_mode<synchronous>, transform_indices = @transform_6, window_bounds = array<i64: 1, 4>}, {transform_indices = @transform_7, window_bounds = array<i64: 1, 8, 16, 4>}]} {
    %c8_i32 = arith.constant 8 : i32
    %0 = arith.muli %arg1, %c8_i32 : i32
    %1 = tpu.assume_multiple %0, 8 : i32
    %c0_i32 = arith.constant 0 : i32
    %2 = arith.cmpi eq, %arg1, %c0_i32 : i32
    %3 = arith.extui %2 : i1 to i32
    %c0_i32_0 = arith.constant 0 : i32
    %4 = arith.cmpi ne, %3, %c0_i32_0 : i32
    scf.if %4 {
      %cst_45 = arith.constant 0.000000e+00 : bf16
      %100 = vector.broadcast %cst_45 : bf16 to vector<2x16x4xbf16>
      %c0_46 = arith.constant 0 : index
      %c0_47 = arith.constant 0 : index
      %c0_48 = arith.constant 0 : index
      %101 = vector.load %arg10[%c0_46, %c0_47, %c0_48] : memref<20x16x4xbf16, #tpu.memory_space<vmem>>, vector<2x16x4xbf16>
      tpu.vector_store %arg10[%c0_46, %c0_47, %c0_48], %100 {strides = array<i32>} : memref<20x16x4xbf16, #tpu.memory_space<vmem>>, vector<2x16x4xbf16>,
      %c18 = arith.constant 18 : index
      %c0_49 = arith.constant 0 : index
      %c0_50 = arith.constant 0 : index
      %102 = vector.load %arg10[%c18, %c0_49, %c0_50] : memref<20x16x4xbf16, #tpu.memory_space<vmem>>, vector<2x16x4xbf16>
      tpu.vector_store %arg10[%c18, %c0_49, %c0_50], %100 {strides = array<i32>} : memref<20x16x4xbf16, #tpu.memory_space<vmem>>, vector<2x16x4xbf16>,
      %c0_51 = arith.constant 0 : index
      %c0_52 = arith.constant 0 : index
      %c0_53 = arith.constant 0 : index
      %c0_54 = arith.constant 0 : index
      %103 = vector.load %arg2[%c0_51, %c0_52, %c0_53, %c0_54] : memref<1x16x16x4xbf16, #tpu.memory_space<vmem>>, vector<1x16x16x4xbf16>
      %104 = vector.shape_cast %103 : vector<1x16x16x4xbf16> to vector<16x16x4xbf16>
      %c2_55 = arith.constant 2 : index
      %c0_56 = arith.constant 0 : index
      %c0_57 = arith.constant 0 : index
      %105 = vector.load %arg10[%c2_55, %c0_56, %c0_57] : memref<20x16x4xbf16, #tpu.memory_space<vmem>>, vector<16x16x4xbf16>
      tpu.vector_store %arg10[%c2_55, %c0_56, %c0_57], %104 {strides = array<i32>} : memref<20x16x4xbf16, #tpu.memory_space<vmem>>, vector<16x16x4xbf16>,
    } else {
    }
    %5 = arith.index_cast %1 : i32 to index
    %c0 = arith.constant 0 : index
    %c0_1 = arith.constant 0 : index
    %6 = vector.load %arg10[%5, %c0, %c0_1] : memref<20x16x4xbf16, #tpu.memory_space<vmem>>, vector<12x16x4xbf16>
    %7 = arith.extf %6 : vector<12x16x4xbf16> to vector<12x16x4xf32>
    %cst = arith.constant 0.000000e+00 : f32
    %8 = vector.broadcast %cst : f32 to vector<12x1x4xf32>
    %9 = vector.extract_strided_slice %7 {offsets = [0, 0, 0], sizes = [12, 15, 4], strides = [1, 1, 1]} : vector<12x16x4xf32> to vector<12x15x4xf32>
    %10 = tpu.concatenate %8, %9 in 1 : vector<12x1x4xf32>, vector<12x15x4xf32> -> vector<12x16x4xf32>
    %11 = vector.extract_strided_slice %7 {offsets = [0, 1, 0], sizes = [12, 15, 4], strides = [1, 1, 1]} : vector<12x16x4xf32> to vector<12x15x4xf32>
    %12 = tpu.concatenate %11, %8 in 1 : vector<12x15x4xf32>, vector<12x1x4xf32> -> vector<12x16x4xf32>
    %13 = tpu.concatenate %10, %7, %12 in 2 : vector<12x16x4xf32>, vector<12x16x4xf32>, vector<12x16x4xf32> -> vector<12x16x12xf32>
    %14 = arith.truncf %13 : vector<12x16x12xf32> to vector<12x16x12xbf16>
    %cst_2 = arith.constant 0.000000e+00 : f32
    %15 = vector.broadcast %cst_2 : f32 to vector<160x4xf32>
    %16 = vector.extract_strided_slice %14 {offsets = [0, 0, 0], sizes = [10, 16, 12], strides = [1, 1, 1]} : vector<12x16x12xbf16> to vector<10x16x12xbf16>
    %17 = vector.shape_cast %16 : vector<10x16x12xbf16> to vector<160x12xbf16>
    %c0_3 = arith.constant 0 : index
    %c0_4 = arith.constant 0 : index
    %c0_5 = arith.constant 0 : index
    %18 = vector.load %arg3[%c0_3, %c0_4, %c0_5] : memref<3x12x4xbf16, #tpu.memory_space<vmem>>, vector<1x12x4xbf16>
    %19 = vector.shape_cast %18 : vector<1x12x4xbf16> to vector<12x4xbf16>
    %cst_6 = arith.constant dense<0.000000e+00> : vector<160x4xf32>
    %20 = tpu.matmul %17, %19, %cst_6 {dimension_numbers = #tpu.dot_dimension_numbers<[1], [0], [0], [1], [0, 0, 1, 1], [], []>} : vector<160x12xbf16>, vector<12x4xbf16>, vector<160x4xf32> -> vector<160x4xf32>
    %21 = arith.addf %15, %20 : vector<160x4xf32>
    %22 = vector.extract_strided_slice %14 {offsets = [1, 0, 0], sizes = [10, 16, 12], strides = [1, 1, 1]} : vector<12x16x12xbf16> to vector<10x16x12xbf16>
    %23 = vector.shape_cast %22 : vector<10x16x12xbf16> to vector<160x12xbf16>
    %c1 = arith.constant 1 : index
    %c0_7 = arith.constant 0 : index
    %c0_8 = arith.constant 0 : index
    %24 = vector.load %arg3[%c1, %c0_7, %c0_8] : memref<3x12x4xbf16, #tpu.memory_space<vmem>>, vector<1x12x4xbf16>
    %25 = vector.shape_cast %24 : vector<1x12x4xbf16> to vector<12x4xbf16>
    %cst_9 = arith.constant dense<0.000000e+00> : vector<160x4xf32>
    %26 = tpu.matmul %23, %25, %cst_9 {dimension_numbers = #tpu.dot_dimension_numbers<[1], [0], [0], [1], [0, 0, 1, 1], [], []>} : vector<160x12xbf16>, vector<12x4xbf16>, vector<160x4xf32> -> vector<160x4xf32>
    %27 = arith.addf %21, %26 : vector<160x4xf32>
    %28 = vector.extract_strided_slice %14 {offsets = [2, 0, 0], sizes = [10, 16, 12], strides = [1, 1, 1]} : vector<12x16x12xbf16> to vector<10x16x12xbf16>
    %29 = vector.shape_cast %28 : vector<10x16x12xbf16> to vector<160x12xbf16>
    %c2 = arith.constant 2 : index
    %c0_10 = arith.constant 0 : index
    %c0_11 = arith.constant 0 : index
    %30 = vector.load %arg3[%c2, %c0_10, %c0_11] : memref<3x12x4xbf16, #tpu.memory_space<vmem>>, vector<1x12x4xbf16>
    %31 = vector.shape_cast %30 : vector<1x12x4xbf16> to vector<12x4xbf16>
    %cst_12 = arith.constant dense<0.000000e+00> : vector<160x4xf32>
    %32 = tpu.matmul %29, %31, %cst_12 {dimension_numbers = #tpu.dot_dimension_numbers<[1], [0], [0], [1], [0, 0, 1, 1], [], []>} : vector<160x12xbf16>, vector<12x4xbf16>, vector<160x4xf32> -> vector<160x4xf32>
    %33 = arith.addf %27, %32 : vector<160x4xf32>
    %c0_13 = arith.constant 0 : index
    %c0_14 = arith.constant 0 : index
    %34 = vector.load %arg4[%c0_13, %c0_14] : memref<1x4xf32, #tpu.memory_space<vmem>>, vector<1x4xf32>
    %35 = vector.broadcast %34 : vector<1x4xf32> to vector<160x4xf32>
    %36 = arith.mulf %33, %35 : vector<160x4xf32>
    %c0_15 = arith.constant 0 : index
    %c0_16 = arith.constant 0 : index
    %37 = vector.load %arg5[%c0_15, %c0_16] : memref<1x4xf32, #tpu.memory_space<vmem>>, vector<1x4xf32>
    %38 = vector.broadcast %37 : vector<1x4xf32> to vector<160x4xf32>
    %39 = arith.addf %36, %38 : vector<160x4xf32>
    %cst_17 = arith.constant 0.000000e+00 : f32
    %40 = vector.broadcast %cst_17 : f32 to vector<160x4xf32>
    %41 = arith.maximumf %39, %40 : vector<160x4xf32>
    %42 = vector.shape_cast %41 : vector<160x4xf32> to vector<10x16x4xf32>
    %43 = tpu.iota {dimensions = array<i32: 0>} : vector<10x1x1xi32>
    %c1_i32 = arith.constant 1 : i32
    %44 = arith.subi %1, %c1_i32 : i32
    %45 = vector.broadcast %44 : i32 to vector<10x1x1xi32>
    %46 = arith.addi %45, %43 : vector<10x1x1xi32>
    %c0_i32_18 = arith.constant 0 : i32
    %47 = vector.broadcast %c0_i32_18 : i32 to vector<10x1x1xi32>
    %48 = arith.cmpi sge, %46, %47 : vector<10x1x1xi32>
    %c16_i32 = arith.constant 16 : i32
    %49 = vector.broadcast %c16_i32 : i32 to vector<10x1x1xi32>
    %50 = arith.cmpi slt, %46, %49 : vector<10x1x1xi32>
    %51 = arith.andi %48, %50 : vector<10x1x1xi1>
    %cst_19 = arith.constant 0.000000e+00 : f32
    %52 = vector.shape_cast %51 : vector<10x1x1xi1> to vector<10x1x1xi1>
    %53 = vector.broadcast %52 : vector<10x1x1xi1> to vector<10x16x4xi1>
    %54 = vector.broadcast %cst_19 : f32 to vector<10x16x4xf32>
    %55 = arith.select %53, %42, %54 : vector<10x16x4xi1>, vector<10x16x4xf32>
    %cst_20 = arith.constant 0.000000e+00 : f32
    %56 = vector.broadcast %cst_20 : f32 to vector<10x1x4xf32>
    %57 = vector.extract_strided_slice %55 {offsets = [0, 0, 0], sizes = [10, 15, 4], strides = [1, 1, 1]} : vector<10x16x4xf32> to vector<10x15x4xf32>
    %58 = tpu.concatenate %56, %57 in 1 : vector<10x1x4xf32>, vector<10x15x4xf32> -> vector<10x16x4xf32>
    %59 = vector.extract_strided_slice %55 {offsets = [0, 1, 0], sizes = [10, 15, 4], strides = [1, 1, 1]} : vector<10x16x4xf32> to vector<10x15x4xf32>
    %60 = tpu.concatenate %59, %56 in 1 : vector<10x15x4xf32>, vector<10x1x4xf32> -> vector<10x16x4xf32>
    %61 = tpu.concatenate %58, %55, %60 in 2 : vector<10x16x4xf32>, vector<10x16x4xf32>, vector<10x16x4xf32> -> vector<10x16x12xf32>
    %62 = arith.truncf %61 : vector<10x16x12xf32> to vector<10x16x12xbf16>
    %cst_21 = arith.constant 0.000000e+00 : f32
    %63 = vector.broadcast %cst_21 : f32 to vector<128x4xf32>
    %64 = vector.extract_strided_slice %62 {offsets = [0, 0, 0], sizes = [8, 16, 12], strides = [1, 1, 1]} : vector<10x16x12xbf16> to vector<8x16x12xbf16>
    %65 = vector.shape_cast %64 : vector<8x16x12xbf16> to vector<128x12xbf16>
    %c0_22 = arith.constant 0 : index
    %c0_23 = arith.constant 0 : index
    %c0_24 = arith.constant 0 : index
    %66 = vector.load %arg6[%c0_22, %c0_23, %c0_24] : memref<3x12x4xbf16, #tpu.memory_space<vmem>>, vector<1x12x4xbf16>
    %67 = vector.shape_cast %66 : vector<1x12x4xbf16> to vector<12x4xbf16>
    %cst_25 = arith.constant dense<0.000000e+00> : vector<128x4xf32>
    %68 = tpu.matmul %65, %67, %cst_25 {dimension_numbers = #tpu.dot_dimension_numbers<[1], [0], [0], [1], [0, 0, 1, 1], [], []>} : vector<128x12xbf16>, vector<12x4xbf16>, vector<128x4xf32> -> vector<128x4xf32>
    %69 = arith.addf %63, %68 : vector<128x4xf32>
    %70 = vector.extract_strided_slice %62 {offsets = [1, 0, 0], sizes = [8, 16, 12], strides = [1, 1, 1]} : vector<10x16x12xbf16> to vector<8x16x12xbf16>
    %71 = vector.shape_cast %70 : vector<8x16x12xbf16> to vector<128x12xbf16>
    %c1_26 = arith.constant 1 : index
    %c0_27 = arith.constant 0 : index
    %c0_28 = arith.constant 0 : index
    %72 = vector.load %arg6[%c1_26, %c0_27, %c0_28] : memref<3x12x4xbf16, #tpu.memory_space<vmem>>, vector<1x12x4xbf16>
    %73 = vector.shape_cast %72 : vector<1x12x4xbf16> to vector<12x4xbf16>
    %cst_29 = arith.constant dense<0.000000e+00> : vector<128x4xf32>
    %74 = tpu.matmul %71, %73, %cst_29 {dimension_numbers = #tpu.dot_dimension_numbers<[1], [0], [0], [1], [0, 0, 1, 1], [], []>} : vector<128x12xbf16>, vector<12x4xbf16>, vector<128x4xf32> -> vector<128x4xf32>
    %75 = arith.addf %69, %74 : vector<128x4xf32>
    %76 = vector.extract_strided_slice %62 {offsets = [2, 0, 0], sizes = [8, 16, 12], strides = [1, 1, 1]} : vector<10x16x12xbf16> to vector<8x16x12xbf16>
    %77 = vector.shape_cast %76 : vector<8x16x12xbf16> to vector<128x12xbf16>
    %c2_30 = arith.constant 2 : index
    %c0_31 = arith.constant 0 : index
    %c0_32 = arith.constant 0 : index
    %78 = vector.load %arg6[%c2_30, %c0_31, %c0_32] : memref<3x12x4xbf16, #tpu.memory_space<vmem>>, vector<1x12x4xbf16>
    %79 = vector.shape_cast %78 : vector<1x12x4xbf16> to vector<12x4xbf16>
    %cst_33 = arith.constant dense<0.000000e+00> : vector<128x4xf32>
    %80 = tpu.matmul %77, %79, %cst_33 {dimension_numbers = #tpu.dot_dimension_numbers<[1], [0], [0], [1], [0, 0, 1, 1], [], []>} : vector<128x12xbf16>, vector<12x4xbf16>, vector<128x4xf32> -> vector<128x4xf32>
    %81 = arith.addf %75, %80 : vector<128x4xf32>
    %c2_i32 = arith.constant 2 : i32
    %82 = arith.addi %1, %c2_i32 : i32
    %83 = arith.index_cast %82 : i32 to index
    %c0_34 = arith.constant 0 : index
    %c0_35 = arith.constant 0 : index
    %84 = vector.load %arg10[%83, %c0_34, %c0_35] : memref<20x16x4xbf16, #tpu.memory_space<vmem>>, vector<8x16x4xbf16>
    %85 = arith.extf %84 : vector<8x16x4xbf16> to vector<8x16x4xf32>
    %86 = vector.shape_cast %85 : vector<8x16x4xf32> to vector<128x4xf32>
    %c0_36 = arith.constant 0 : index
    %c0_37 = arith.constant 0 : index
    %87 = vector.load %arg7[%c0_36, %c0_37] : memref<1x4xf32, #tpu.memory_space<vmem>>, vector<1x4xf32>
    %88 = vector.broadcast %87 : vector<1x4xf32> to vector<128x4xf32>
    %89 = arith.mulf %81, %88 : vector<128x4xf32>
    %c0_38 = arith.constant 0 : index
    %c0_39 = arith.constant 0 : index
    %90 = vector.load %arg8[%c0_38, %c0_39] : memref<1x4xf32, #tpu.memory_space<vmem>>, vector<1x4xf32>
    %91 = vector.broadcast %90 : vector<1x4xf32> to vector<128x4xf32>
    %92 = arith.addf %89, %91 : vector<128x4xf32>
    %93 = arith.addf %92, %86 : vector<128x4xf32>
    %cst_40 = arith.constant 0.000000e+00 : f32
    %94 = vector.broadcast %cst_40 : f32 to vector<128x4xf32>
    %95 = arith.maximumf %93, %94 : vector<128x4xf32>
    %96 = vector.shape_cast %95 : vector<128x4xf32> to vector<8x16x4xf32>
    %c0_41 = arith.constant 0 : index
    %c0_42 = arith.constant 0 : index
    %c0_43 = arith.constant 0 : index
    %c0_44 = arith.constant 0 : index
    %97 = vector.load %arg9[%c0_41, %c0_42, %c0_43, %c0_44] : memref<1x8x16x4xf32, #tpu.memory_space<vmem>>, vector<1x8x16x4xf32>
    %98 = vector.shape_cast %97 : vector<1x8x16x4xf32> to vector<8x16x4xf32>
    %99 = vector.shape_cast %96 : vector<8x16x4xf32> to vector<1x8x16x4xf32>
    tpu.vector_store %arg9[%c0_41, %c0_42, %c0_43, %c0_44], %99 {strides = array<i32>} : memref<1x8x16x4xf32, #tpu.memory_space<vmem>>, vector<1x8x16x4xf32>,
    return
  }
  func.func @transform_0(%arg0: i32, %arg1: i32) -> (i32, i32, i32, i32) {
    %c0_i32 = arith.constant 0 : i32
    %c0_i32_0 = arith.constant 0 : i32
    %c0_i32_1 = arith.constant 0 : i32
    %c0_i32_2 = arith.constant 0 : i32
    return %arg0, %c0_i32, %c0_i32_0, %c0_i32_1 : i32, i32, i32, i32
  }
  func.func @transform_1(%arg0: i32, %arg1: i32) -> (i32, i32, i32) {
    %c0_i32 = arith.constant 0 : i32
    %c0_i32_0 = arith.constant 0 : i32
    %c0_i32_1 = arith.constant 0 : i32
    %c0_i32_2 = arith.constant 0 : i32
    return %c0_i32, %c0_i32_0, %c0_i32_1 : i32, i32, i32
  }
  func.func @transform_2(%arg0: i32, %arg1: i32) -> (i32, i32) {
    %c0_i32 = arith.constant 0 : i32
    %c0_i32_0 = arith.constant 0 : i32
    %c0_i32_1 = arith.constant 0 : i32
    return %c0_i32, %c0_i32_0 : i32, i32
  }
  func.func @transform_3(%arg0: i32, %arg1: i32) -> (i32, i32) {
    %c0_i32 = arith.constant 0 : i32
    %c0_i32_0 = arith.constant 0 : i32
    %c0_i32_1 = arith.constant 0 : i32
    return %c0_i32, %c0_i32_0 : i32, i32
  }
  func.func @transform_4(%arg0: i32, %arg1: i32) -> (i32, i32, i32) {
    %c0_i32 = arith.constant 0 : i32
    %c0_i32_0 = arith.constant 0 : i32
    %c0_i32_1 = arith.constant 0 : i32
    %c0_i32_2 = arith.constant 0 : i32
    return %c0_i32, %c0_i32_0, %c0_i32_1 : i32, i32, i32
  }
  func.func @transform_5(%arg0: i32, %arg1: i32) -> (i32, i32) {
    %c0_i32 = arith.constant 0 : i32
    %c0_i32_0 = arith.constant 0 : i32
    %c0_i32_1 = arith.constant 0 : i32
    return %c0_i32, %c0_i32_0 : i32, i32
  }
  func.func @transform_6(%arg0: i32, %arg1: i32) -> (i32, i32) {
    %c0_i32 = arith.constant 0 : i32
    %c0_i32_0 = arith.constant 0 : i32
    %c0_i32_1 = arith.constant 0 : i32
    return %c0_i32, %c0_i32_0 : i32, i32
  }
  func.func @transform_7(%arg0: i32, %arg1: i32) -> (i32, i32, i32, i32) {
    %c0_i32 = arith.constant 0 : i32
    %c0_i32_0 = arith.constant 0 : i32
    %c0_i32_1 = arith.constant 0 : i32
    return %arg0, %arg1, %c0_i32, %c0_i32_0 : i32, i32, i32, i32
  }
}

</mosaic_0001>

<bundles_post_ra>
// kernel: basic_block_forward.1
= control target key start
LH: loop header
LB: loop body
LE: loop exit
PB: predicated region body
PF: predicated region fallthrough
CT: control target
= control target key end

     0   :  { %s3102_s24 = smov 0   ;;  %s3104_s25 = smov 0   ;;  %s4236_s0 = inlined_call_operand.vmem [shape: bf16[2,16,16,4], index: 0, kind: input, shape index: {}]   ;;  %s4237_s1 = inlined_call_operand.vmem [shape: bf16[3,12,4], index: 1, kind: input, shape index: {}]   ;;  %s4238_s2 = inlined_call_operand.vmem [shape: f32[1,4], index: 2, kind: input, shape index: {}]   ;;  %s4239_s3 = inlined_call_operand.vmem [shape: f32[1,4], index: 3, kind: input, shape index: {}]   ;;  %s4240_s4 = inlined_call_operand.vmem [shape: bf16[3,12,4], index: 4, kind: input, shape index: {}]   ;;  %s4241_s5 = inlined_call_operand.vmem [shape: f32[1,4], index: 5, kind: input, shape index: {}]   ;;  %s4242_s6 = inlined_call_operand.vmem [shape: f32[1,4], index: 6, kind: input, shape index: {}]   ;;  %s4243_s7 = inlined_call_operand.vmem [shape: f32[2,16,16,4], index: 7, kind: output, shape index: {}]  }
   0x1   :  { %s3106_s26 = smov 0   ;;  %s3108_s27 = smov 0  }
   0x2   :  { %s3110_s28 = smov 0  }
   0x3 LB: > { %s26_s29 = sadd.s32 1, %s3049_s26  ;;  %s29_s30 = sadd.s32 1, %s3053_s27  ;;  %s3057_s28 = sphi %s3110_s28, %s17_s28   ;;  %s3053_s27 = sphi %s3108_s27, %s4263_s27   ;;  %s3049_s26 = sphi %s3106_s26, %s4262_s26   ;;  %s3045_s25 = sphi %s3104_s25, %s4261_s25   ;;  %s3041_s24 = sphi %s3102_s24, %s4260_s24  }
   0x4   : > { %p27_p0 = scmp.ge.s32.totalorder %s26_s29, 2  ;;  %p2359_p1 = scmp.ge.s32.totalorder %s3057_s28, 1 }
   0x5   : > { %p251_p2 = scmp.lt.s32.totalorder %s3057_s28, 5 }
   0x6   : > { %s4265_s29 = smov (%p27_p0, %s26_s29), 0  ;;  %s4267_s30 = smov (!%p27_p0, %s29_s30), %s3053_s27 }
   0x7   : > { %p252_p3 = pnand %p2359_p1, %p251_p2  ;;  %p31_p4 = scmp.ge.s32.totalorder %s4267_s30, 2 }
   0x8   : > { %p288_p5 = scmp.lt.s32.totalorder (!%p252_p3), %s3045_s25, 1  ;;  %s3135_s8 = sshll.u32 (!%p252_p3), %s3041_s24, 3 }
   0x9   : > { %s4269_s30 = smov (%p31_p4, %s4267_s30), 0  ;;  %255 = sbr.rel (%p252_p3) target bundleno = 912 (0x390), region = 48 }
   0xa   : > { %p296_p6 = scmp.lt.s32.totalorder (!%p252_p3), %s3135_s8, 15  ;;  %p2367_p7 = scmp.ne.s32.totalorder (!%p252_p3), %s3041_s24, 0 }
  0x10   : > { %s4271_s25 = smov (!%p288_p5, %s3045_s25), 1  ;;  %309 = sbr.rel (%p2367_p7) target bundleno = 29 (0x1d), region = 52 }
  0x11   : > { %s297_s9 = scalar_select %p296_p6, %s3135_s8, 15 }
  0x12   : > { %s2470_s10 = sshll.u32 %s4271_s25, 7  ;;  %s2364_s11 = sshll.u32 %s4271_s25, 5  ;;  %vm310_vm0 = vcmask (!%p2367_p7), 31744   ;;  %v3059_v0 = vmov (!%p2367_p7), 0  }
  0x13   : > { %s3142_s14 = scalar_lea.vmem %s4236_s0, %s2470_s10  ;;  %s2363_s15 = sshll.u32 %s297_s9, 1  ;;  %311 = vst.msk [vmem:[#allocation2] sm:$0xff] (!%p2367_p7), %vm310_vm0, %v3059_v0  ;;  %312 = vst.msk [vmem:[#allocation2 + $0x8] sm:$0xff] (!%p2367_p7), %vm310_vm0, %v3059_v0 }
  0x14   : > { %s300_s16 = sadd.s32 %s2364_s11, %s2363_s15  ;;  %314 = vst.msk [vmem:[#allocation2 + $0x90] sm:$0xff] (!%p2367_p7), %vm310_vm0, %v3059_v0  ;;  %315 = vst.msk [vmem:[#allocation2 + $0x98] sm:$0xff] (!%p2367_p7), %vm310_vm0, %v3059_v0  ;;  %v2777_v1 = vld [vmem:[%s3142_s14] sm:$0xff] (!%p2367_p7)   ;;  %v2778_v2 = vld [vmem:[%s3142_s14 + $0x8] sm:$0xff] (!%p2367_p7)  }
  0x15   : > { %s2365_s17 = sshll.u32 %s300_s16, 3  ;;  %445 = vst.msk [vmem:[#allocation2 + $0x10] sm:$0xff] (!%p2367_p7), %vm310_vm0, %v2777_v1  ;;  %v2779_v3 = vld [vmem:[%s3142_s14 + $0x10] sm:$0xff] (!%p2367_p7)   ;;  %446 = vst.msk [vmem:[#allocation2 + $0x18] sm:$0xff] (!%p2367_p7), %vm310_vm0, %v2778_v2  ;;  %v2780_v4 = vld [vmem:[%s3142_s14 + $0x18] sm:$0xff] (!%p2367_p7)  }
  0x16   : > { %s3147_s20 = scalar_lea.vmem %s4243_s7, %s2365_s17  ;;  %447 = vst.msk [vmem:[#allocation2 + $0x20] sm:$0xff] (!%p2367_p7), %vm310_vm0, %v2779_v3  ;;  %v2781_v5 = vld [vmem:[%s3142_s14 + $0x20] sm:$0xff] (!%p2367_p7)   ;;  %448 = vst.msk [vmem:[#allocation2 + $0x28] sm:$0xff] (!%p2367_p7), %vm310_vm0, %v2780_v4  ;;  %v2782_v6 = vld [vmem:[%s3142_s14 + $0x28] sm:$0xff] (!%p2367_p7)  }
  0x17   : > { %449 = vst.msk [vmem:[#allocation2 + $0x30] sm:$0xff] %vm310_vm0, %v2781_v5  ;;  %v2783_v7 = vld [vmem:[%s3142_s14 + $0x30] sm:$0xff]   ;;  %450 = vst.msk [vmem:[#allocation2 + $0x38] sm:$0xff] %vm310_vm0, %v2782_v6  ;;  %v2784_v8 = vld [vmem:[%s3142_s14 + $0x38] sm:$0xff]  }
  0x18   : > { %451 = vst.msk [vmem:[#allocation2 + $0x40] sm:$0xff] %vm310_vm0, %v2783_v7  ;;  %v2785_v9 = vld [vmem:[%s3142_s14 + $0x40] sm:$0xff]   ;;  %452 = vst.msk [vmem:[#allocation2 + $0x48] sm:$0xff] %vm310_vm0, %v2784_v8  ;;  %v2786_v10 = vld [vmem:[%s3142_s14 + $0x48] sm:$0xff]  }
  0x19   : > { %453 = vst.msk [vmem:[#allocation2 + $0x50] sm:$0xff] %vm310_vm0, %v2785_v9  ;;  %v2787_v11 = vld [vmem:[%s3142_s14 + $0x50] sm:$0xff]   ;;  %454 = vst.msk [vmem:[#allocation2 + $0x58] sm:$0xff] %vm310_vm0, %v2786_v10  ;;  %v2788_v12 = vld [vmem:[%s3142_s14 + $0x58] sm:$0xff]  }
  0x1a   : > { %455 = vst.msk [vmem:[#allocation2 + $0x60] sm:$0xff] %vm310_vm0, %v2787_v11  ;;  %v2789_v13 = vld [vmem:[%s3142_s14 + $0x60] sm:$0xff]   ;;  %456 = vst.msk [vmem:[#allocation2 + $0x68] sm:$0xff] %vm310_vm0, %v2788_v12  ;;  %v2790_v14 = vld [vmem:[%s3142_s14 + $0x68] sm:$0xff]  }
  0x1b   : > { %457 = vst.msk [vmem:[#allocation2 + $0x70] sm:$0xff] %vm310_vm0, %v2789_v13  ;;  %v2791_v15 = vld [vmem:[%s3142_s14 + $0x70] sm:$0xff]   ;;  %458 = vst.msk [vmem:[#allocation2 + $0x78] sm:$0xff] %vm310_vm0, %v2790_v14  ;;  %v2792_v16 = vld [vmem:[%s3142_s14 + $0x78] sm:$0xff]  }
  0x1c   : > { %459 = vst.msk [vmem:[#allocation2 + $0x80] sm:$0xff] %vm310_vm0, %v2791_v15  ;;  %460 = vst.msk [vmem:[#allocation2 + $0x88] sm:$0xff] %vm310_vm0, %v2792_v16 }
  0x1d PF: > { %s2471_s21 = sshll.u32 %s3041_s24, 6  ;;  %vm596_vm1 = vcmask 1046528   ;;  %vm916_vm2 = vcmask 1045504   ;;  %v3218_v34 = vld [vmem:[%s4237_s1 + $0x8] sm:$0x3f]   ;;  %s3060_s25 = smov 4  }
  0x1e   : > { %s3187_s22 = scalar_lea.vmem [#allocation2], %s2471_s21  ;;  %2727 = vmatprep.subr.msk.bf16.mxu0 %vm916_vm2, %v3218_v34  ;;  %2728 = vmatprep.subr.msk.bf16.mxu1 %vm916_vm2, %v3218_v34  ;;  %s3061_s9 = smov 8   ;;  %vm523_vm3 = vcmask 1040384   ;;  %vm813_vm4 = vcmask 31744   ;;  %vm838_vm5 = vcmask 64512   ;;  %vm885_vm6 = vcmask 97280  }
  0x1f   : > { %s2424_s14 = sadd.s32 4294967295, %s3135_s8 }
  0x23   : > { %v464_v17 = vld [vmem:[%s3187_s22 + $0x8] sm:$0xff]  ;;  %v465_v18 = vld [vmem:[%s3187_s22 + $0x10] sm:$0xff]  ;;  %v466_v19 = vld [vmem:[%s3187_s22 + $0x18] sm:$0xff] }
  0x24   : > { %v3192_v20 = vunpack.c.l.bf16 %v464_v17  ;;  %v3194_v21 = vunpack.c.h.bf16 %v464_v17  ;;  %v3196_v22 = vunpack.c.l.bf16 %v465_v18  ;;  %v3198_v23 = vunpack.c.h.bf16 %v465_v18  ;;  %v467_v24 = vld [vmem:[%s3187_s22 + $0x20] sm:$0xff]  ;;  %v468_v43 = vld [vmem:[%s3187_s22 + $0x28] sm:$0xff]  ;;  %v469_v45 = vld [vmem:[%s3187_s22 + $0x30] sm:$0xff] }
  0x25   : > { %v3201_v25 = vunpack.c.l.bf16 %v466_v19  ;;  %v3203_v26 = vunpack.c.h.bf16 %v466_v19  ;;  %v3211_v32 = vunpack.c.l.bf16 %v467_v24  ;;  %v3213_v33 = vunpack.c.h.bf16 %v467_v24  ;;  %v470_v56 = vld [vmem:[%s3187_s22 + $0x38] sm:$0xff]  ;;  %v471_v60 = vld [vmem:[%s3187_s22 + $0x40] sm:$0xff] }
  0x26   : > { %v2793_v27 = vpack.i.bf16 %v3194_v21, %v3192_v20  ;;  %v600_v28 = vrot.slane %v3192_v20, 1  ;;  %v601_v29 = vrot.slane %v3194_v21, 1  ;;  %v603_v30 = vrot.slane %v3196_v22, 1  ;;  %v463_v16 = vld [vmem:[%s3187_s22] sm:$0xff] }
  0x27   : > { %v604_v31 = vrot.slane %v3198_v23, 1  ;;  %v2798_v37 = vpack.i.bf16 %v3198_v23, %v3196_v22  ;;  %v606_v38 = vrot.slane %v3201_v25, 1  ;;  %v607_v42 = vrot.slane %v3203_v26, 1 }
  0x28   : > { %2794 = vrot.lane.b32.xlu0 %v2793_v27, %s3060_s25  ;;  %v602_v35 = vsel %vm596_vm1, %v600_v28, %v601_v29  ;;  %v646_v36 = vsel %vm596_vm1, %v601_v29, 0.0  ;;  %v2803_v46 = vpack.i.bf16 %v3203_v26, %v3201_v25  ;;  %v609_v47 = vrot.slane %v3211_v32, 1  ;;  %v472_v29 = vld [vmem:[%s3187_s22 + $0x48] sm:$0xff] }
  0x29   : > { %v2808_v39 = vpack.i.bf16 %v646_v36, %v602_v35  ;;  %v605_v40 = vsel %vm596_vm1, %v603_v30, %v604_v31  ;;  %v647_v41 = vsel %vm596_vm1, %v604_v31, 0.0  ;;  %v610_v48 = vrot.slane %v3213_v33, 1  ;;  %v3299_v31 = vld [vmem:[%s4237_s1] sm:$0x3f]  }
  0x2a   : > { %v2813_v44 = vpack.i.bf16 %v647_v41, %v605_v40  ;;  %v608_v49 = vsel %vm596_vm1, %v606_v38, %v607_v42  ;;  %v648_v50 = vsel %vm596_vm1, %v607_v42, 0.0  ;;  %v3243_v51 = vunpack.c.l.bf16 %v468_v43 }
  0x2b   : > { %2809 = vrot.lane.b32.xlu1 %v2808_v39, %s3061_s9  ;;  %v3245_v52 = vunpack.c.h.bf16 %v468_v43  ;;  %v3247_v53 = vunpack.c.l.bf16 %v469_v45  ;;  %v3249_v54 = vunpack.c.h.bf16 %v469_v45  ;;  %v2818_v55 = vpack.i.bf16 %v3213_v33, %v3211_v32 }
  0x2c   : > { %2799 = vrot.lane.b32.xlu0 %v2798_v37, %s3060_s25  ;;  %v2823_v57 = vpack.i.bf16 %v648_v50, %v608_v49  ;;  %v611_v58 = vsel %vm596_vm1, %v609_v47, %v610_v48  ;;  %v649_v59 = vsel %vm596_vm1, %v610_v48, 0.0  ;;  %v612_v61 = vrot.slane %v3243_v51, 1 }
  0x2d   : > { %v613_v62 = vrot.slane %v3245_v52, 1  ;;  %v615_v63 = vrot.slane %v3247_v53, 1  ;;  %v616_v0 = vrot.slane %v3249_v54, 1  ;;  %v3263_v1 = vunpack.c.l.bf16 %v470_v56 }
  0x2e   : > { %v3265_v2 = vunpack.c.h.bf16 %v470_v56  ;;  %v2828_v3 = vpack.i.bf16 %v649_v59, %v611_v58  ;;  %v3268_v4 = vunpack.c.l.bf16 %v471_v60  ;;  %v3270_v5 = vunpack.c.h.bf16 %v471_v60 }
  0x2f   : > { %2814 = vrot.lane.b32.xlu1 %v2813_v44, %s3061_s9  ;;  %v2833_v6 = vpack.i.bf16 %v3245_v52, %v3243_v51  ;;  %v614_v7 = vsel %vm596_vm1, %v612_v61, %v613_v62  ;;  %v650_v8 = vsel %vm596_vm1, %v613_v62, 0.0  ;;  %v617_v9 = vsel %vm596_vm1, %v615_v63, %v616_v0 }
  0x30   : > { %2804 = vrot.lane.b32.xlu0 %v2803_v46, %s3060_s25  ;;  %v651_v10 = vsel %vm596_vm1, %v616_v0, 0.0  ;;  %v618_v11 = vrot.slane %v3263_v1, 1  ;;  %v619_v12 = vrot.slane %v3265_v2, 1  ;;  %v2838_v13 = vpack.i.bf16 %v3249_v54, %v3247_v53  ;;  %v473_v0 = vld [vmem:[%s3187_s22 + $0x50] sm:$0xff] }
  0x31   : > { %v621_v14 = vrot.slane %v3268_v4, 1  ;;  %v622_v15 = vrot.slane %v3270_v5, 1  ;;  %v2843_v17 = vpack.i.bf16 %v650_v8, %v614_v7  ;;  %v528_v18 = vrot.slane %v3194_v21, 7 }
  0x32   : > { %v2848_v19 = vpack.i.bf16 %v651_v10, %v617_v9  ;;  %v2853_v24 = vpack.i.bf16 %v3265_v2, %v3263_v1  ;;  %v620_v27 = vsel %vm596_vm1, %v618_v11, %v619_v12  ;;  %v3292_v28 = vunpack.c.l.bf16 %v463_v16  ;;  %v474_v10 = vld [vmem:[%s3187_s22 + $0x58] sm:$0xff] }
  0x33   : > { %2819 = vrot.lane.b32.xlu1 %v2818_v55, %s3060_s25  ;;  %v530_v30 = vrot.slane %v3196_v22, 7  ;;  %v652_v21 = vsel %vm596_vm1, %v619_v12, 0.0  ;;  %v623_v35 = vsel %vm596_vm1, %v621_v14, %v622_v15  ;;  %v476_v36 = vunpack.c.h.bf16 %v463_v16 }
  0x34   : > { %2824 = vrot.lane.b32.xlu0 %v2823_v57, %s3061_s9  ;;  %v531_v37 = vrot.slane %v3198_v23, 7  ;;  %v653_v38 = vsel %vm596_vm1, %v622_v15, 0.0  ;;  %v533_v39 = vrot.slane %v3201_v25, 7  ;;  %v534_v40 = vrot.slane %v3203_v26, 7  ;;  %v3455_v25 = vld [vmem:[%s4237_s1 + $0x10] sm:$0x3f]  }
  0x35   : > { %v918_v41 = vsel %vm916_vm2, %v3218_v34, 0  ;;  %v2858_v42 = vpack.i.bf16 %v3270_v5, %v3268_v4  ;;  %v3313_v43 = vunpack.c.l.bf16 %v472_v29  ;;  %v527_v44 = vrot.slane %v3192_v20, 7 }
  0x36   : > { %v3318_v23 = vsel %vm523_vm3, %v530_v30, %v531_v37  ;;  %2534 = vmatpush3.bf16.msra.mxu0 %v918_v41  ;;  %2654 = vmatpush3.bf16.msra.mxu1 %v918_v41  ;;  %v2863_v45 = vpack.i.bf16 %v652_v21, %v620_v27  ;;  %v597_v26 = vrot.slane %v3292_v28, 1  ;;  %v3325_v34 = vsel %vm523_vm3, %v533_v39, %v534_v40 }
  0x37   : > { %2829 = vrot.lane.b32.xlu1 %v2828_v3, %s3061_s9  ;;  %v536_v46 = vrot.slane %v3211_v32, 7  ;;  %2729 = vmatprep.subr.msk.bf16.mxu0 %vm916_vm2, %v3299_v31  ;;  %v2868_v47 = vpack.i.bf16 %v653_v38, %v623_v35  ;;  %v598_v48 = vrot.slane %v476_v36, 1  ;;  %v3334_v49 = vsel %vm523_vm3, %v527_v44, %v528_v18 }
  0x38   : > { %2834 = vrot.lane.b32.xlu0 %v2833_v6, %s3060_s25  ;;  %v537_v50 = vrot.slane %v3213_v33, 7  ;;  %v494_v55 = vunpack.c.h.bf16 %v472_v29  ;;  %v539_v56 = vrot.slane %v3243_v51, 7  ;;  %v540_v57 = vrot.slane %v3245_v52, 7 }
  0x39   : > { %v542_v58 = vrot.slane %v3247_v53, 7  ;;  %v543_v60 = vrot.slane %v3249_v54, 7  ;;  %v545_v61 = vrot.slane %v3263_v1, 7  ;;  %v546_v33 = vrot.slane %v3265_v2, 7 }
  0x3a   : > { %v3344_v59 = vsel %vm523_vm3, %v536_v46, %v537_v50  ;;  %v2873_v62 = vpack.i.bf16 %v476_v36, %v3292_v28  ;;  %v624_v63 = vrot.slane %v3313_v43, 1  ;;  %v3355_v52 = vsel %vm523_vm3, %v539_v56, %v540_v57 }
  0x3b   : > { %2839 = vrot.lane.b32.xlu1 %v2838_v13, %s3060_s25  ;;  %v548_v3 = vrot.slane %v3268_v4, 7  ;;  %v599_v54 = vsel %vm596_vm1, %v597_v26, %v598_v48  ;;  %v3363_v2 = vsel %vm523_vm3, %v542_v58, %v543_v60  ;;  %v3368_v6 = vsel %vm523_vm3, %v545_v61, %v546_v33 }
  0x3c   : > { %2844 = vrot.lane.b32.xlu0 %v2843_v17, %s3061_s9  ;;  %v549_v7 = vrot.slane %v3270_v5, 7  ;;  %v645_v8 = vsel %vm596_vm1, %v598_v48, 0.0  ;;  %v625_v9 = vrot.slane %v494_v55, 1  ;;  %v525_v11 = vrot.slane %v476_v36, 7 }
  0x3d   : > { %v524_v12 = vrot.slane %v3292_v28, 7  ;;  %v3375_v13 = vunpack.c.l.bf16 %v473_v0  ;;  %v496_v14 = vunpack.c.h.bf16 %v473_v0  ;;  %v2878_v16 = vpack.i.bf16 %v645_v8, %v599_v54 }
  0x3e   : > { %v3380_v15 = vsel %vm523_vm3, %v548_v3, %v549_v7  ;;  %v3388_v17 = vunpack.c.l.bf16 %v474_v10  ;;  %v2883_v18 = vpack.i.bf16 %v494_v55, %v3313_v43  ;;  %v3394_v27 = vunpack.c.h.bf16 %v474_v10 }
  0x3f   : > { %2849 = vrot.lane.b32.xlu1 %v2848_v19, %s3061_s9  ;;  %v3385_v5 = vsel %vm523_vm3, %v524_v12, %v525_v11  ;;  %v626_v19 = vsel %vm596_vm1, %v624_v63, %v625_v9  ;;  %v627_v29 = vrot.slane %v3375_v13, 1  ;;  %v628_v21 = vrot.slane %v496_v14, 1 }
  0x40   : > { %2854 = vrot.lane.b32.xlu0 %v2853_v24, %s3060_s25  ;;  %v654_v24 = vsel %vm596_vm1, %v625_v9, 0.0  ;;  %v2893_v36 = vpack.i.bf16 %v496_v14, %v3375_v13  ;;  %v630_v37 = vrot.slane %v3388_v17, 1  ;;  %v631_v38 = vrot.slane %v3394_v27, 1 }
  0x41   : > { %v2888_v35 = vpack.i.bf16 %v654_v24, %v626_v19  ;;  %v629_v40 = vsel %vm596_vm1, %v627_v29, %v628_v21  ;;  %v655_v41 = vsel %vm596_vm1, %v628_v21, 0.0  ;;  %v551_v50 = vrot.slane %v3313_v43, 7 }
  0x42   : > { %v632_v26 = vsel %vm596_vm1, %v630_v37, %v631_v38  ;;  %v552_v57 = vrot.slane %v494_v55, 7  ;;  %v554_v33 = vrot.slane %v3375_v13, 7  ;;  %v585_v54 = vsel %vm523_vm3, 0.0, %v527_v44 }
  0x43   : > { %2859 = vrot.lane.b32.xlu1 %v2858_v42, %s3060_s25  ;;  %v2898_v42 = vpack.i.bf16 %v3394_v27, %v3388_v17 }
  0x44   : > { %2864 = vrot.lane.b32.xlu0 %v2863_v45, %s3061_s9  ;;  %v2903_v45 = vpack.i.bf16 %v655_v41, %v629_v40  ;;  %v3417_v60 = vsel %vm523_vm3, %v551_v50, %v552_v57 }
  0x47   : > { %2869 = vrot.lane.b32.xlu1 %v2868_v47, %s3061_s9  ;;  %v656_v47 = vsel %vm596_vm1, %v631_v38, 0.0 }
  0x48   : > { %2874 = vrot.lane.b32.xlu0 %v2873_v62, %s3060_s25  ;;  %v2908_v48 = vpack.i.bf16 %v656_v47, %v632_v26  ;;  %v555_v62 = vrot.slane %v496_v14, 7  ;;  %v1042_v26 = vsel %vm916_vm2, %v3299_v31, 0  ;;  %v588_v31 = vsel %vm523_vm3, 0.0, %v536_v46 }
  0x4a   : > { %v3423_v63 = vsel %vm523_vm3, %v554_v33, %v555_v62 }
  0x4b   : > { %2879 = vrot.lane.b32.xlu1 %v2878_v16, %s3061_s9  ;;  %v586_v16 = vsel %vm523_vm3, 0.0, %v530_v30  ;;  %v587_v30 = vsel %vm523_vm3, 0.0, %v533_v39 }
  0x4c   : > { %2884 = vrot.lane.b32.xlu0 %v2883_v18, %s3060_s25 }
  0x4f   : > { %2889 = vrot.lane.b32.xlu1 %v2888_v35, %s3061_s9 }
  0x50   : > { %2894 = vrot.lane.b32.xlu0 %v2893_v36, %s3060_s25 }
  0x53   : > { %2899 = vrot.lane.b32.xlu1 %v2898_v42, %s3060_s25 }
  0x54   : > { %2904 = vrot.lane.b32.xlu0 %v2903_v45, %s3061_s9 }
  0x57   : > { %2909 = vrot.lane.b32.xlu1 %v2908_v48, %s3061_s9 }
  0x9a   : > { %v2795_v0 = vpop.permute.xlu0 %2794 }
  0x9b   : > { %v2797_v55 = vunpack.i.h.bf16 %v2795_v0  ;;  %v2796_v7 = vunpack.i.l.bf16 %v2795_v0 }
  0x9d   : > { %v2810_v8 = vpop.permute.xlu1 %2809  ;;  %v816_v9 = vsel %vm813_vm4, %v585_v54, %v2796_v7  ;;  %v817_v10 = vsel %vm813_vm4, %v3334_v49, %v2797_v55 }
  0x9e   : > { %v2812_v11 = vunpack.i.h.bf16 %v2810_v8  ;;  %v2811_v14 = vunpack.i.l.bf16 %v2810_v8  ;;  %v2800_v18 = vpop.permute.xlu0 %2799 }
  0x9f   : > { %v2802_v19 = vunpack.i.h.bf16 %v2800_v18  ;;  %v2801_v20 = vunpack.i.l.bf16 %v2800_v18 }
  0xa0   : > { %v841_v44 = vsel %vm838_vm5, %v816_v9, %v2811_v14  ;;  %v842_v24 = vsel %vm838_vm5, %v817_v10, %v2812_v11  ;;  %v589_v11 = vsel %vm523_vm3, 0.0, %v539_v56 }
  0xa1   : > { %v819_v29 = vsel %vm813_vm4, %v3318_v23, %v2802_v19  ;;  %v818_v21 = vsel %vm813_vm4, %v586_v16, %v2801_v20  ;;  %v2815_v49 = vpop.permute.xlu1 %2814  ;;  %v3439_v35 = vpack.c.bf16 %v842_v24, %v841_v44 }
  0xa2   : > { %v2817_v36 = vunpack.i.h.bf16 %v2815_v49  ;;  %v2816_v22 = vunpack.i.l.bf16 %v2815_v49  ;;  %v2805_v37 = vpop.permute.xlu0 %2804 }
  0xa3   : > { %v2807_v38 = vunpack.i.h.bf16 %v2805_v37  ;;  %v2806_v40 = vunpack.i.l.bf16 %v2805_v37  ;;  %2535 = vmatprep.mubr.msk.bf16.mxu0 %vm885_vm6, %v3439_v35 }
  0xa4   : > { %v844_v41 = vsel %vm838_vm5, %v819_v29, %v2817_v36  ;;  %v843_v23 = vsel %vm838_vm5, %v818_v21, %v2816_v22  ;;  %v590_v22 = vsel %vm523_vm3, 0.0, %v542_v58 }
  0xa5   : > { %v3448_v42 = vpack.c.bf16 %v844_v41, %v843_v23  ;;  %v2820_v45 = vpop.permute.xlu1 %2819  ;;  %v821_v39 = vsel %vm813_vm4, %v3325_v34, %v2807_v38  ;;  %v820_v47 = vsel %vm813_vm4, %v587_v30, %v2806_v40  ;;  %v591_v23 = vsel %vm523_vm3, 0.0, %v545_v61 }
  0xa6   : > { %v2825_v48 = vpop.permute.xlu0 %2824  ;;  %v2822_v57 = vunpack.i.h.bf16 %v2820_v45  ;;  %v2821_v62 = vunpack.i.l.bf16 %v2820_v45 }
  0xa7   : > { %v2827_v0 = vunpack.i.h.bf16 %v2825_v48  ;;  %v2826_v54 = vunpack.i.l.bf16 %v2825_v48  ;;  %2536 = vmatmul.mubr.msk.bf16.vlgmr.msra.gmra.mrb[0].mxu0 %vm885_vm6, %v3448_v42 }
  0xa8   : > { %2556 = vmatpush3.bf16.msra.mxu0 %v1042_v26  ;;  %v823_v46 = vsel %vm813_vm4, %v3344_v59, %v2822_v57  ;;  %v822_v14 = vsel %vm813_vm4, %v588_v31, %v2821_v62 }
  0xa9   : > { %v845_v55 = vsel %vm838_vm5, %v820_v47, %v2826_v54  ;;  %v846_v7 = vsel %vm838_vm5, %v821_v39, %v2827_v0  ;;  %v2830_v34 = vpop.permute.xlu1 %2829  ;;  %2730 = vmatprep.subr.msk.bf16.mxu0 %vm916_vm2, %v3455_v25 }
  0xaa   : > { %v3469_v8 = vpack.c.bf16 %v846_v7, %v845_v55  ;;  %v2832_v9 = vunpack.i.h.bf16 %v2830_v34  ;;  %v2831_v10 = vunpack.i.l.bf16 %v2830_v34  ;;  %v2835_v32 = vpop.permute.xlu0 %2834  ;;  %v592_v7 = vsel %vm523_vm3, 0.0, %v548_v3 }
  0xab   : > { %v2837_v16 = vunpack.i.h.bf16 %v2835_v32  ;;  %v2836_v18 = vunpack.i.l.bf16 %v2835_v32 }
  0xac   : > { %v847_v19 = vsel %vm838_vm5, %v822_v14, %v2831_v10  ;;  %v848_v20 = vsel %vm838_vm5, %v823_v46, %v2832_v9  ;;  %2539 = vmatprep.mubr.msk.bf16.mxu0 %vm885_vm6, %v3469_v8  ;;  %v584_v14 = vsel %vm523_vm3, 0.0, %v524_v12 }
  0xad   : > { %v3481_v44 = vpack.c.bf16 %v848_v20, %v847_v19  ;;  %v2840_v51 = vpop.permute.xlu1 %2839  ;;  %v825_v56 = vsel %vm813_vm4, %v3355_v52, %v2837_v16  ;;  %v824_v24 = vsel %vm813_vm4, %v589_v11, %v2836_v18 }
  0xae   : > { %v2845_v59 = vpop.permute.xlu0 %2844  ;;  %v2842_v29 = vunpack.i.h.bf16 %v2840_v51  ;;  %v2841_v21 = vunpack.i.l.bf16 %v2840_v51 }
  0xaf   : > { %v2847_v49 = vunpack.i.h.bf16 %v2845_v59  ;;  %v2846_v36 = vunpack.i.l.bf16 %v2845_v59  ;;  %2540 = vmatmul.mubr.msk.bf16.gmra.mrb[4].mxu0 %vm885_vm6, %v3481_v44  ;;  %v593_v59 = vsel %vm523_vm3, 0.0, %v551_v50  ;;  %v594_v50 = vsel %vm523_vm3, 0.0, %v554_v33 }
  0xb0   : > { %v827_v26 = vsel %vm813_vm4, %v3363_v2, %v2842_v29  ;;  %v826_v53 = vsel %vm813_vm4, %v590_v22, %v2841_v21 }
  0xb1   : > { %v849_v37 = vsel %vm838_vm5, %v824_v24, %v2846_v36  ;;  %v850_v30 = vsel %vm838_vm5, %v825_v56, %v2847_v49  ;;  %v2850_v38 = vpop.permute.xlu1 %2849 }
  0xb2   : > { %v3493_v52 = vpack.c.bf16 %v850_v30, %v849_v37  ;;  %v2852_v40 = vunpack.i.h.bf16 %v2850_v38  ;;  %v2851_v41 = vunpack.i.l.bf16 %v2850_v38  ;;  %v2855_v45 = vpop.permute.xlu0 %2854 }
  0xb3   : > { %v2857_v58 = vunpack.i.h.bf16 %v2855_v45  ;;  %v2856_v39 = vunpack.i.l.bf16 %v2855_v45 }
  0xb4   : > { %v851_v47 = vsel %vm838_vm5, %v826_v53, %v2851_v41  ;;  %v852_v48 = vsel %vm838_vm5, %v827_v26, %v2852_v40  ;;  %2543 = vmatprep.mubr.msk.bf16.mxu0 %vm885_vm6, %v3493_v52 }
  0xb5   : > { %v3505_v57 = vpack.c.bf16 %v852_v48, %v851_v47  ;;  %v2860_v1 = vpop.permute.xlu1 %2859  ;;  %v829_v61 = vsel %vm813_vm4, %v3368_v6, %v2857_v58  ;;  %v828_v62 = vsel %vm813_vm4, %v591_v23, %v2856_v39 }
  0xb6   : > { %v2865_v2 = vpop.permute.xlu0 %2864  ;;  %v2862_v0 = vunpack.i.h.bf16 %v2860_v1  ;;  %v2861_v54 = vunpack.i.l.bf16 %v2860_v1 }
  0xb7   : > { %v2867_v31 = vunpack.i.h.bf16 %v2865_v2  ;;  %v2866_v55 = vunpack.i.l.bf16 %v2865_v2  ;;  %2544 = vmatmul.mubr.msk.bf16.gmra.mrb[8].mxu0 %vm885_vm6, %v3505_v57 }
  0xb8   : > { %v831_v16 = vsel %vm813_vm4, %v3380_v15, %v2862_v0  ;;  %v830_v4 = vsel %vm813_vm4, %v592_v7, %v2861_v54 }
  0xb9   : > { %v853_v34 = vsel %vm838_vm5, %v828_v62, %v2866_v55  ;;  %v854_v9 = vsel %vm838_vm5, %v829_v61, %v2867_v31  ;;  %v2870_v10 = vpop.permute.xlu1 %2869 }
  0xba   : > { %v3517_v6 = vpack.c.bf16 %v854_v9, %v853_v34  ;;  %v2872_v11 = vunpack.i.h.bf16 %v2870_v10  ;;  %v2871_v32 = vunpack.i.l.bf16 %v2870_v10  ;;  %v2875_v46 = vpop.permute.xlu0 %2874 }
  0xbb   : > { %v2877_v3 = vunpack.i.h.bf16 %v2875_v46  ;;  %v2876_v18 = vunpack.i.l.bf16 %v2875_v46 }
  0xbc   : > { %v855_v19 = vsel %vm838_vm5, %v830_v4, %v2871_v32  ;;  %v856_v20 = vsel %vm838_vm5, %v831_v16, %v2872_v11  ;;  %2547 = vmatprep.mubr.msk.bf16.mxu0 %vm885_vm6, %v3517_v6  ;;  %v3611_v32 = vld [vmem:[%s4238_s2] ss:$0 sm:$0xff] }
  0xbd   : > { %v871_v51 = vpack.c.bf16 %v856_v20, %v855_v19  ;;  %v814_v56 = vsel %vm813_vm4, %v584_v14, %v2876_v18  ;;  %v815_v28 = vsel %vm813_vm4, %v3385_v5, %v2877_v3  ;;  %v2880_v12 = vpop.permute.xlu1 %2879  ;;  %v3616_v14 = vld [vmem:[%s4239_s3] ss:$0 sm:$0xff] }
  0xbe   : > { %v2882_v24 = vunpack.i.h.bf16 %v2880_v12  ;;  %v2881_v15 = vunpack.i.l.bf16 %v2880_v12  ;;  %v2885_v29 = vpop.permute.xlu0 %2884 }
  0xbf   : > { %2548 = vmatmul.mubr.msk.bf16.gmra.mrb[12].mxu0 %vm885_vm6, %v871_v51  ;;  %v2887_v21 = vunpack.i.h.bf16 %v2885_v29  ;;  %v2886_v49 = vunpack.i.l.bf16 %v2885_v29 }
  0xc0   : > { %v839_v36 = vsel %vm838_vm5, %v814_v56, %v2881_v15  ;;  %v840_v22 = vsel %vm838_vm5, %v815_v28, %v2882_v24 }
  0xc1   : > { %v863_v37 = vpack.c.bf16 %v840_v22, %v839_v36  ;;  %v833_v5 = vsel %vm813_vm4, %v3417_v60, %v2887_v21  ;;  %v832_v30 = vsel %vm813_vm4, %v593_v59, %v2886_v49  ;;  %v2890_v38 = vpop.permute.xlu1 %2889  ;;  %v1169_v60 = vsel %vm916_vm2, %v3455_v25, 0 }
  0xc2   : > { %v2892_v40 = vunpack.i.h.bf16 %v2890_v38  ;;  %v2891_v43 = vunpack.i.l.bf16 %v2890_v38  ;;  %v2895_v41 = vpop.permute.xlu0 %2894 }
  0xc3   : > { %2557 = vmatprep.mubr.msk.bf16.mxu0 %vm885_vm6, %v863_v37  ;;  %v2897_v23 = vunpack.i.h.bf16 %v2895_v41  ;;  %v2896_v45 = vunpack.i.l.bf16 %v2895_v41 }
  0xc4   : > { %v857_v26 = vsel %vm838_vm5, %v832_v30, %v2891_v43  ;;  %v858_v53 = vsel %vm838_vm5, %v833_v5, %v2892_v40 }
  0xc5   : > { %v872_v58 = vpack.c.bf16 %v858_v53, %v857_v26  ;;  %v835_v39 = vsel %vm813_vm4, %v3423_v63, %v2897_v23  ;;  %v834_v47 = vsel %vm813_vm4, %v594_v50, %v2896_v45  ;;  %v2900_v63 = vpop.permute.xlu1 %2899 }
  0xc6   : > { %v2905_v48 = vpop.permute.xlu0 %2904  ;;  %v2901_v62 = vunpack.i.l.bf16 %v2900_v63 }
  0xc7   : > { %2558 = vmatmul.mubr.msk.bf16.vlgmr.msra.gmra.mrb[0].mxu0 %vm885_vm6, %v3439_v35  ;;  %2551 = vmatprep.mubr.msk.bf16.mxu1 %vm885_vm6, %v872_v58  ;;  %v2907_v13 = vunpack.i.h.bf16 %v2905_v48  ;;  %v2906_v33 = vunpack.i.l.bf16 %v2905_v48  ;;  %v557_v35 = vrot.slane %v3388_v17, 7 }
  0xc8   : > { %2578 = vmatpush3.bf16.msra.mxu0 %v1169_v60  ;;  %2561 = vmatprep.mubr.msk.bf16.mxu0 %vm885_vm6, %v3448_v42 }
  0xc9   : > { %v859_v25 = vsel %vm838_vm5, %v834_v47, %v2906_v33  ;;  %v860_v1 = vsel %vm838_vm5, %v835_v39, %v2907_v13  ;;  %v2910_v2 = vpop.permute.xlu1 %2909  ;;  %v3671_v47 = vld [vmem:[%s4240_s4 + $0x8] sm:$0x3f]  }
  0xca   : > { %v873_v61 = vpack.c.bf16 %v860_v1, %v859_v25  ;;  %v2912_v0 = vunpack.i.h.bf16 %v2910_v2  ;;  %2731 = vmatprep.subr.msk.bf16.mxu1 %vm916_vm2, %v3671_v47 }
  0xcc   : > { %2552 = vmatmul.mubr.msk.bf16.vlgmr.msra.gmra.mrb[0].mxu1 %vm885_vm6, %v873_v61 }
  0xcf   : > { %2562 = vmatmul.mubr.msk.bf16.gmra.mrb[4].mxu0 %vm885_vm6, %v3469_v8 }
  0xd0   : > { %2565 = vmatprep.mubr.msk.bf16.mxu0 %vm885_vm6, %v3481_v44 }
  0xd7   : > { %2566 = vmatmul.mubr.msk.bf16.gmra.mrb[8].mxu0 %vm885_vm6, %v3493_v52 }
  0xd8   : > { %2569 = vmatprep.mubr.msk.bf16.mxu0 %vm885_vm6, %v3505_v57 }
  0xdf   : > { %2570 = vmatmul.mubr.msk.bf16.gmra.mrb[12].mxu0 %vm885_vm6, %v3517_v6 }
  0xe0   : > { %2573 = vmatprep.mubr.msk.bf16.mxu0 %vm885_vm6, %v871_v51 }
  0xe7   : > { %2574 = vmatmul.mubr.msk.bf16.gmra.mrb[16].mxu0 %vm885_vm6, %v872_v58 }
  0xe8   : > { %2579 = vmatprep.mubr.msk.bf16.mxu0 %vm885_vm6, %v3448_v42  ;;  %v558_v42 = vrot.slane %v3394_v27, 7 }
  0xef   : > { %2580 = vmatmul.mubr.msk.bf16.vlgmr.msra.gmra.mrb[0].mxu0 %vm885_vm6, %v3469_v8  ;;  %v2902_v8 = vunpack.i.h.bf16 %v2900_v63 }
  0xf0   : > { %2583 = vmatprep.mubr.msk.bf16.mxu0 %vm885_vm6, %v3481_v44  ;;  %v559_v44 = vsel %vm523_vm3, %v557_v35, %v558_v42 }
  0xf1   : > { %v837_v54 = vsel %vm813_vm4, %v559_v44, %v2902_v8 }
  0xf2   : > { %v862_v27 = vsel %vm838_vm5, %v837_v54, %v2912_v0 }
  0xf7   : > { %2584 = vmatmul.mubr.msk.bf16.gmra.mrb[4].mxu0 %vm885_vm6, %v3493_v52  ;;  %v595_v52 = vsel %vm523_vm3, 0.0, %v557_v35 }
  0xf8   : > { %2587 = vmatprep.mubr.msk.bf16.mxu0 %vm885_vm6, %v3505_v57  ;;  %v2911_v57 = vunpack.i.l.bf16 %v2910_v2  ;;  %v836_v31 = vsel %vm813_vm4, %v595_v52, %v2901_v62 }
  0xfa   : > { %v861_v17 = vsel %vm838_vm5, %v836_v31, %v2911_v57 }
  0xfb   : > { %v874_v55 = vpack.c.bf16 %v862_v27, %v861_v17 }
  0xff   : > { %2588 = vmatmul.mubr.msk.bf16.gmra.mrb[8].mxu0 %vm885_vm6, %v3517_v6  ;;  %v3605_v6 = vstv %s2424_s14 }
 0x100   : > { %2591 = vmatprep.mubr.msk.bf16.mxu0 %vm885_vm6, %v871_v51  ;;  %v1380_v11 = vadd.s32 1, %v3605_v6  ;;  %vm1389_vm9 = vcmp.ge.s32.totalorder %v3605_v6, 0  ;;  %vm1399_vm10 = vcmp.lt.s32.totalorder %v3605_v6, 16  ;;  %v1382_v19 = vadd.s32 3, %v3605_v6 }
 0x101   : > { %v1381_v28 = vadd.s32 2, %v3605_v6  ;;  %vm3632_vm12 = vmand %vm1389_vm9, %vm1399_vm10  ;;  %v3647_v40 = vadd.s32 5, %v3605_v6  ;;  %v3655_v23 = vadd.s32 4, %v3605_v6  ;;  %v3658_v45 = vadd.s32 7, %v3605_v6 }
 0x102   : > { %vm1390_vm7 = vcmp.ge.s32.totalorder %v1380_v11, 0  ;;  %vm1400_vm8 = vcmp.lt.s32.totalorder %v1380_v11, 16  ;;  %vm1392_vm13 = vcmp.ge.s32.totalorder %v1382_v19, 0  ;;  %vm1402_vm14 = vcmp.lt.s32.totalorder %v1382_v19, 16 }
 0x103   : > { %vm3626_vm11 = vmand %vm1390_vm7, %vm1400_vm8  ;;  %vm1391_vm15 = vcmp.ge.s32.totalorder %v1381_v28, 0  ;;  %vm1401_vm0 = vcmp.lt.s32.totalorder %v1381_v28, 16  ;;  %vm1394_vm7 = vcmp.ge.s32.totalorder %v3647_v40, 0  ;;  %vm1404_vm8 = vcmp.lt.s32.totalorder %v3647_v40, 16 }
 0x104   : > { %vm3689_vm9 = vmand %vm1392_vm13, %vm1402_vm14  ;;  %vm1393_vm10 = vcmp.ge.s32.totalorder %v3655_v23, 0  ;;  %v3712_v11 = vadd.s32 9, %v3605_v6  ;;  %vm1396_vm13 = vcmp.ge.s32.totalorder %v3658_v45, 0  ;;  %vm1406_vm14 = vcmp.lt.s32.totalorder %v3658_v45, 16 }
 0x107   : > { %2592 = vmatmul.mubr.msk.bf16.gmra.mrb[12].mxu0 %vm885_vm6, %v872_v58 }
 0x108   : > { %2595 = vmatprep.mubr.msk.bf16.mxu0 %vm885_vm6, %v873_v61 }
 0x10f   : > { %2596 = vmatmul.mubr.msk.bf16.gmra.mrb[16].mxu0 %vm885_vm6, %v874_v55  ;;  %v3709_v55 = vadd.s32 6, %v3605_v6 }
 0x19f   : > { %v3596_v7 = vpop.f32.mrb[0].mxu1 }
 0x1a0   : > { %v3598_v34 = vpop.f32.mrb[1].mxu1 }
 0x1a1   : > { %v3600_v9 = vpop.f32.mrb[2].mxu1 }
 0x1a2   : > { %v3602_v10 = vpop.f32.mrb[3].mxu1 }
 0x1c2   : > { %v2581_v46 = vpop.f32.mrb[0].mxu0 }
 0x1c3   : > { %v1313_v16 = vmul.f32 %v2581_v46, %v3611_v32  ;;  %v1205_v4 = vpop.f32.mrb[1].mxu0 }
 0x1c4   : > { %v1311_v3 = vmul.f32 %v3611_v32, %v1205_v4  ;;  %v2582_v18 = vpop.f32.mrb[2].mxu0 }
 0x1c5   : > { %v1340_v20 = vadd.f32 %v3616_v14, %v1313_v16  ;;  %v1314_v51 = vmul.f32 %v2582_v18, %v3611_v32  ;;  %v1208_v56 = vpop.f32.mrb[3].mxu0  ;;  %v3721_v18 = vadd.s32 8, %v3605_v6 }
 0x1c6   : > { %v1338_v24 = vadd.f32 %v3616_v14, %v1311_v3  ;;  %v1312_v15 = vmul.f32 %v3611_v32, %v1208_v56 }
 0x1c7   : > { %v1360_v59 = vmax.f32 %v1340_v20, 0.0  ;;  %v1341_v21 = vadd.f32 %v3616_v14, %v1314_v51 }
 0x1c8   : > { %v1358_v49 = vmax.f32 %v1338_v24, 0.0  ;;  %v1339_v36 = vadd.f32 %v3616_v14, %v1312_v15 }
 0x1c9   : > { %v3640_v22 = vsel %vm3626_vm11, %v1360_v59, 0.0  ;;  %v1361_v37 = vmax.f32 %v1341_v21, 0.0 }
 0x1ca   : > { %v3644_v5 = vsel %vm3632_vm12, %v1358_v49, 0.0  ;;  %v1359_v30 = vmax.f32 %v1339_v36, 0.0  ;;  %v2585_v38 = vpop.f32.mrb[4].mxu0  ;;  %v1542_v26 = vrot.slane %v3640_v22, 1  ;;  %v1482_v46 = vrot.slane %v3640_v22, 7 }
 0x1cb   : > { %v3651_v43 = vsel %vm3626_vm11, %v1361_v37, 0.0  ;;  %v1317_v41 = vmul.f32 %v2585_v38, %v3611_v32  ;;  %v1221_v50 = vpop.f32.mrb[5].mxu0  ;;  %v1539_v48 = vrot.slane %v3644_v5, 1  ;;  %vm3703_vm11 = vmand %vm1391_vm15, %vm1401_vm0  ;;  %vm1395_vm15 = vcmp.ge.s32.totalorder %v3709_v55, 0 }
 0x1cc   : > { %v3663_v53 = vsel %vm3632_vm12, %v1359_v30, 0.0  ;;  %v1315_v60 = vmul.f32 %v3611_v32, %v1221_v50  ;;  %v2586_v58 = vpop.f32.mrb[6].mxu0  ;;  %v2913_v39 = vpack.i.bf16 %v3651_v43, %v3640_v22  ;;  %v1543_v1 = vrot.slane %v3651_v43, 1 }
 0x1cd   : > { %v1344_v13 = vadd.f32 %v3616_v14, %v1317_v41  ;;  %v1318_v33 = vmul.f32 %v2586_v58, %v3611_v32  ;;  %v1224_v25 = vpop.f32.mrb[7].mxu0  ;;  %v2993_v35 = vpack.i.bf16 %v3663_v53, %v3644_v5  ;;  %v1540_v42 = vrot.slane %v3663_v53, 1 }
 0x1ce   : > { %v1342_v61 = vadd.f32 %v3616_v14, %v1315_v60  ;;  %v1316_v63 = vmul.f32 %v3611_v32, %v1224_v25  ;;  %2914 = vrot.lane.b32.xlu0 %v2913_v39, %s3060_s25  ;;  %v1544_v44 = vsel %vm596_vm1, %v1542_v26, %v1543_v1  ;;  %v1580_v52 = vsel %vm596_vm1, %v1543_v1, 0.0 }
 0x1cf   : > { %v1364_v8 = vmax.f32 %v1344_v13, 0.0  ;;  %v1345_v2 = vadd.f32 %v3616_v14, %v1318_v33  ;;  %v2918_v54 = vpack.i.bf16 %v1580_v52, %v1544_v44  ;;  %v3699_v31 = vsel %vm596_vm1, %v1539_v48, %v1540_v42 }
 0x1d0   : > { %v1362_v0 = vmax.f32 %v1342_v61, 0.0  ;;  %v1343_v57 = vadd.f32 %v3616_v14, %v1316_v63  ;;  %vm1403_vm12 = vcmp.lt.s32.totalorder %v3655_v23, 16  ;;  %v1483_v19 = vrot.slane %v3651_v43, 7 }
 0x1d1   : > { %v1365_v27 = vmax.f32 %v1345_v2, 0.0  ;;  %v3717_v16 = vsel %vm3689_vm9, %v1364_v8, 0.0  ;;  %v3732_v28 = vsel %vm596_vm1, %v1540_v42, 0.0  ;;  %vm1405_vm0 = vcmp.lt.s32.totalorder %v3709_v55, 16 }
 0x1d2   : > { %v1363_v4 = vmax.f32 %v1343_v57, 0.0  ;;  %2919 = vrot.lane.b32.xlu0 %v2918_v54, %s3061_s9  ;;  %v2589_v3 = vpop.f32.mrb[8].mxu0  ;;  %v3736_v6 = vsel %vm3703_vm11, %v1362_v0, 0.0  ;;  %v1548_v29 = vrot.slane %v3717_v16, 1  ;;  %v2998_v60 = vpack.i.bf16 %v3732_v28, %v3699_v31 }
 0x1d3   : > { %v3726_v20 = vsel %vm3689_vm9, %v1365_v27, 0.0  ;;  %v1321_v51 = vmul.f32 %v2589_v3, %v3611_v32  ;;  %v1237_v56 = vpop.f32.mrb[9].mxu0  ;;  %v1545_v50 = vrot.slane %v3736_v6, 1  ;;  %v3765_v58 = vsel %vm523_vm3, %v1482_v46, %v1483_v19  ;;  %vm3774_vm9 = vmand %vm1394_vm7, %vm1404_vm8 }
 0x1d4   : > { %v3740_v12 = vsel %vm3703_vm11, %v1363_v4, 0.0  ;;  %v1319_v24 = vmul.f32 %v3611_v32, %v1237_v56  ;;  %v2590_v15 = vpop.f32.mrb[10].mxu0  ;;  %v2923_v59 = vpack.i.bf16 %v3726_v20, %v3717_v16  ;;  %v1549_v43 = vrot.slane %v3726_v20, 1  ;;  %vm1413_vm11 = vmand %vm1393_vm10, %vm1403_vm12 }
 0x1d5   : > { %v1348_v21 = vadd.f32 %v3616_v14, %v1321_v51  ;;  %v1322_v49 = vmul.f32 %v2590_v15, %v3611_v32  ;;  %v1240_v36 = vpop.f32.mrb[11].mxu0  ;;  %v2928_v37 = vpack.i.bf16 %v3740_v12, %v3736_v6  ;;  %v1546_v41 = vrot.slane %v3740_v12, 1  ;;  %vm3810_vm7 = vmand %vm1396_vm13, %vm1406_vm14 }
 0x1d6   : > { %v1346_v30 = vadd.f32 %v3616_v14, %v1319_v24  ;;  %v1320_v38 = vmul.f32 %v3611_v32, %v1240_v36  ;;  %2924 = vrot.lane.b32.xlu0 %v2923_v59, %s3060_s25  ;;  %v1550_v13 = vsel %vm596_vm1, %v1548_v29, %v1549_v43  ;;  %v1582_v33 = vsel %vm596_vm1, %v1549_v43, 0.0  ;;  %vm1415_vm14 = vmand %vm1395_vm15, %vm1405_vm0 }
 0x1d7   : > { %v1349_v26 = vadd.f32 %v3616_v14, %v1322_v49  ;;  %2929 = vrot.lane.b32.xlu1 %v2928_v37, %s3060_s25  ;;  %v1368_v39 = vmax.f32 %v1348_v21, 0.0  ;;  %v2933_v63 = vpack.i.bf16 %v1582_v33, %v1550_v13  ;;  %v1547_v42 = vsel %vm596_vm1, %v1545_v50, %v1546_v41 }
 0x1d8   : > { %v1347_v48 = vadd.f32 %v3616_v14, %v1320_v38  ;;  %v1366_v1 = vmax.f32 %v1346_v30, 0.0  ;;  %v1479_v8 = vrot.slane %v3644_v5, 7  ;;  %v1480_v62 = vrot.slane %v3663_v53, 7 }
 0x1d9   : > { %v1369_v61 = vmax.f32 %v1349_v26, 0.0  ;;  %v1488_v2 = vrot.slane %v3717_v16, 7  ;;  %v1485_v52 = vrot.slane %v3736_v6, 7  ;;  %v1489_v0 = vrot.slane %v3726_v20, 7 }
 0x1da   : > { %v1367_v40 = vmax.f32 %v1347_v48, 0.0  ;;  %v2593_v44 = vpop.f32.mrb[12].mxu0  ;;  %2934 = vrot.lane.b32.xlu0 %v2933_v63, %s3061_s9  ;;  %v3796_v27 = vsel %vm3774_vm9, %v1368_v39, 0.0  ;;  %v1581_v4 = vsel %vm596_vm1, %v1546_v41, 0.0  ;;  %v3802_v20 = vsel %vm1413_vm11, %v1366_v1, 0.0 }
 0x1db   : > { %v3790_v57 = vsel %vm3774_vm9, %v1369_v61, 0.0  ;;  %v1325_v54 = vmul.f32 %v2593_v44, %v3611_v32  ;;  %v1253_v17 = vpop.f32.mrb[13].mxu0  ;;  %v2938_v56 = vpack.i.bf16 %v1581_v4, %v1547_v42  ;;  %vm1398_vm8 = vcmp.ge.s32.totalorder %v3712_v11, 0 }
 0x1dc   : > { %v3798_v23 = vsel %vm1413_vm11, %v1367_v40, 0.0  ;;  %v1323_v3 = vmul.f32 %v3611_v32, %v1253_v17  ;;  %v2594_v19 = vpop.f32.mrb[14].mxu0  ;;  %v2943_v49 = vpack.i.bf16 %v3790_v57, %v3796_v27  ;;  %vm1408_vm10 = vcmp.lt.s32.totalorder %v3712_v11, 16  ;;  %v3907_v11 = vld [vmem:[%s4240_s4] sm:$0x3f]  }
 0x1dd   : > { %v1352_v51 = vadd.f32 %v3616_v14, %v1325_v54  ;;  %v1326_v24 = vmul.f32 %v2594_v19, %v3611_v32  ;;  %v1256_v15 = vpop.f32.mrb[15].mxu0  ;;  %v2948_v36 = vpack.i.bf16 %v3798_v23, %v3802_v20  ;;  %v1554_v45 = vrot.slane %v3796_v27, 1  ;;  %2939 = vrot.lane.b32.xlu1 %v2938_v56, %s3061_s9  ;;  %vm3890_vm15 = vmand %vm1398_vm8, %vm1408_vm10 }
 0x1de   : > { %v1350_v29 = vadd.f32 %v3616_v14, %v1323_v3  ;;  %v1324_v21 = vmul.f32 %v3611_v32, %v1256_v15  ;;  %v1555_v38 = vrot.slane %v3790_v57, 1  ;;  %vm1397_vm12 = vcmp.ge.s32.totalorder %v3721_v18, 0  ;;  %2944 = vrot.lane.b32.xlu0 %v2943_v49, %s3060_s25 }
 0x1df   : > { %v1372_v37 = vmax.f32 %v1352_v51, 0.0  ;;  %v1353_v30 = vadd.f32 %v3616_v14, %v1326_v24  ;;  %vm1407_vm13 = vcmp.lt.s32.totalorder %v3721_v18, 16  ;;  %v1552_v50 = vrot.slane %v3798_v23, 1 }
 0x1e0   : > { %v1370_v43 = vmax.f32 %v1350_v29, 0.0  ;;  %v1351_v41 = vadd.f32 %v3616_v14, %v1324_v21  ;;  %v3834_v26 = vsel %vm523_vm3, %v1488_v2, %v1489_v0  ;;  %v1556_v13 = vsel %vm596_vm1, %v1554_v45, %v1555_v38  ;;  %vm3900_vm0 = vmand %vm1397_vm12, %vm1407_vm13 }
 0x1e1   : > { %v3838_v39 = vsel %vm3810_vm7, %v1372_v37, 0.0  ;;  %v1373_v48 = vmax.f32 %v1353_v30, 0.0  ;;  %v1584_v33 = vsel %vm596_vm1, %v1555_v38, 0.0  ;;  %v1486_v25 = vrot.slane %v3740_v12, 7  ;;  %2949 = vrot.lane.b32.xlu1 %v2948_v36, %s3060_s25 }
 0x1e2   : > { %v1494_v1 = vrot.slane %v3796_v27, 7  ;;  %v1551_v61 = vrot.slane %v3802_v20, 1  ;;  %v1371_v63 = vmax.f32 %v1351_v41, 0.0  ;;  %v2597_v42 = vpop.f32.mrb[16].mxu0  ;;  %v1491_v40 = vrot.slane %v3802_v20, 7 }
 0x1e3   : > { %v1495_v44 = vrot.slane %v3790_v57, 7  ;;  %v3853_v0 = vsel %vm3810_vm7, %v1373_v48, 0.0  ;;  %v2953_v12 = vpack.i.bf16 %v1584_v33, %v1556_v13  ;;  %v1269_v54 = vpop.f32.mrb[17].mxu0  ;;  %v1560_v17 = vrot.slane %v3838_v39, 1 }
 0x1e4   : > { %v3857_v4 = vsel %vm1415_vm14, %v1371_v63, 0.0  ;;  %v2655_v55 = vadd.f32 %v2597_v42, %v3596_v7  ;;  %v1553_v3 = vsel %vm596_vm1, %v1551_v61, %v1552_v50  ;;  %v2598_v19 = vpop.f32.mrb[18].mxu0  ;;  %v3861_v51 = vsel %vm1415_vm14, %v1370_v43, 0.0 }
 0x1e5   : > { %2954 = vrot.lane.b32.xlu0 %v2953_v12, %s3061_s9  ;;  %v1583_v56 = vsel %vm596_vm1, %v1552_v50, 0.0  ;;  %v2656_v24 = vadd.f32 %v1269_v54, %v3598_v34  ;;  %v2657_v15 = vadd.f32 %v2598_v19, %v3600_v9  ;;  %v1272_v59 = vpop.f32.mrb[19].mxu0  ;;  %v2963_v7 = vpack.i.bf16 %v3853_v0, %v3838_v39 }
 0x1e6   : > { %v1329_v29 = vmul.f32 %v2655_v55, %v3611_v32  ;;  %v2958_v21 = vpack.i.bf16 %v1583_v56, %v1553_v3  ;;  %v2658_v49 = vadd.f32 %v1272_v59, %v3602_v10  ;;  %v2968_v37 = vpack.i.bf16 %v3857_v4, %v3861_v51 }
 0x1e7   : > { %v1327_v36 = vmul.f32 %v2656_v24, %v3611_v32  ;;  %v1330_v45 = vmul.f32 %v2657_v15, %v3611_v32  ;;  %v1561_v34 = vrot.slane %v3853_v0, 1  ;;  %v1557_v9 = vrot.slane %v3861_v51, 1 }
 0x1e8   : > { %v1356_v30 = vadd.f32 %v3616_v14, %v1329_v29  ;;  %2959 = vrot.lane.b32.xlu1 %v2958_v21, %s3061_s9  ;;  %v1328_v10 = vmul.f32 %v2658_v49, %v3611_v32  ;;  %v1558_v38 = vrot.slane %v3857_v4, 1  ;;  %v1492_v18 = vrot.slane %v3798_v23, 7 }
 0x1e9   : > { %v1354_v43 = vadd.f32 %v3616_v14, %v1327_v36  ;;  %v1357_v41 = vadd.f32 %v3616_v14, %v1330_v45  ;;  %2964 = vrot.lane.b32.xlu0 %v2963_v7, %s3060_s25  ;;  %v1562_v50 = vsel %vm596_vm1, %v1560_v17, %v1561_v34  ;;  %v1586_v48 = vsel %vm596_vm1, %v1561_v34, 0.0 }
 0x1ea   : > { %v1376_v32 = vmax.f32 %v1356_v30, 0.0  ;;  %v1355_v33 = vadd.f32 %v3616_v14, %v1328_v10  ;;  %v2973_v61 = vpack.i.bf16 %v1586_v48, %v1562_v50  ;;  %v1559_v63 = vsel %vm596_vm1, %v1557_v9, %v1558_v38 }
 0x1eb   : > { %v1374_v12 = vmax.f32 %v1354_v43, 0.0  ;;  %v1377_v54 = vmax.f32 %v1357_v41, 0.0  ;;  %v1585_v14 = vsel %vm596_vm1, %v1558_v38, 0.0  ;;  %v3913_v17 = vsel %vm523_vm3, %v1485_v52, %v1486_v25 }
 0x1ec   : > { %v1375_v55 = vmax.f32 %v1355_v33, 0.0  ;;  %2969 = vrot.lane.b32.xlu1 %v2968_v37, %s3060_s25  ;;  %v2978_v3 = vpack.i.bf16 %v1585_v14, %v1559_v63  ;;  %v1804_v19 = vsel %vm916_vm2, %v3671_v47, 0  ;;  %v1500_v56 = vrot.slane %v3838_v39, 7 }
 0x1ed   : > { %2974 = vrot.lane.b32.xlu0 %v2973_v61, %s3061_s9  ;;  %v3923_v24 = vsel %vm3900_vm0, %v1374_v12, 0.0  ;;  %v3927_v25 = vsel %vm3890_vm15, %v1376_v32, 0.0  ;;  %v1458_v23 = vsel %vm3890_vm15, %v1377_v54, 0.0  ;;  %2600 = vmatpush3.bf16.msra.mxu1 %v1804_v19  ;;  %v1497_v15 = vrot.slane %v3861_v51, 7 }
 0x1ee   : > { %v1501_v47 = vrot.slane %v3853_v0, 7  ;;  %v1456_v59 = vsel %vm3900_vm0, %v1375_v55, 0.0  ;;  %v3003_v29 = vpack.i.bf16 %v1458_v23, %v3927_v25  ;;  %2732 = vmatprep.subr.msk.bf16.mxu1 %vm916_vm2, %v3907_v11  ;;  %v1498_v21 = vrot.slane %v3857_v4, 7 }
 0x1ef   : > { %v1563_v49 = vrot.slane %v3923_v24, 1  ;;  %v2983_v7 = vpack.i.bf16 %v1456_v59, %v3923_v24  ;;  %v1564_v36 = vrot.slane %v1456_v59, 1  ;;  %v1504_v45 = vrot.slane %v1456_v59, 7 }
 0x1f0   : > { %2979 = vrot.lane.b32.xlu1 %v2978_v3, %s3061_s9  ;;  %v1566_v0 = vrot.slane %v3927_v25, 1  ;;  %v1567_v37 = vrot.slane %v1458_v23, 1  ;;  %v3948_v34 = vsel %vm523_vm3, %v1494_v1, %v1495_v44  ;;  %v1507_v4 = vrot.slane %v1458_v23, 7 }
 0x1f1   : > { %2994 = vrot.lane.b32.xlu0 %v2993_v35, %s3060_s25  ;;  %v1565_v9 = vsel %vm596_vm1, %v1563_v49, %v1564_v36  ;;  %v1587_v30 = vsel %vm596_vm1, %v1564_v36, 0.0  ;;  %v3959_v10 = vsel %vm523_vm3, %v1491_v40, %v1492_v18  ;;  %v1503_v57 = vrot.slane %v3923_v24, 7 }
 0x1f2   : > { %v2988_v38 = vpack.i.bf16 %v1587_v30, %v1565_v9  ;;  %v1568_v44 = vsel %vm596_vm1, %v1566_v0, %v1567_v37  ;;  %v1588_v43 = vsel %vm596_vm1, %v1567_v37, 0.0  ;;  %v1506_v41 = vrot.slane %v3927_v25, 7  ;;  %v2459_v25 = vld [vmem:[%s3187_s22 + $0x18] sm:$0xff] }
 0x1f3   : > { %v3008_v35 = vpack.i.bf16 %v1588_v43, %v1568_v44  ;;  %v3968_v50 = vsel %vm523_vm3, %v1500_v56, %v1501_v47  ;;  %v3973_v48 = vsel %vm523_vm3, %v1497_v15, %v1498_v21  ;;  %v3981_v13 = vsel %vm523_vm3, %v1479_v8, %v1480_v62 }
 0x1f4   : > { %2984 = vrot.lane.b32.xlu1 %v2983_v7, %s3060_s25  ;;  %v3986_v32 = vsel %vm523_vm3, %v1503_v57, %v1504_v45  ;;  %v3992_v33 = vsel %vm523_vm3, %v1506_v41, %v1507_v4  ;;  %v1530_v42 = vsel %vm523_vm3, 0.0, %v1482_v46  ;;  %v1532_v23 = vsel %vm523_vm3, 0.0, %v1488_v2 }
 0x1f5   : > { %3004 = vrot.lane.b32.xlu0 %v3003_v29, %s3060_s25  ;;  %v1531_v16 = vsel %vm523_vm3, 0.0, %v1485_v52  ;;  %v1912_v6 = vsel %vm916_vm2, %v3907_v11, 0  ;;  %v4037_v52 = vld [vmem:[%s4240_s4 + $0x10] sm:$0x3f]   ;;  %v1529_v24 = vsel %vm523_vm3, 0.0, %v1479_v8  ;;  %v1538_v5 = vsel %vm523_vm3, 0.0, %v1506_v41 }
 0x1f6   : > { %v4143_v41 = vld [vmem:[%s4241_s5] ss:$0 sm:$0xff] }
 0x1f8   : > { %2989 = vrot.lane.b32.xlu1 %v2988_v38, %s3061_s9 }
 0x1fc   : > { %2999 = vrot.lane.b32.xlu1 %v2998_v60, %s3061_s9 }
 0x200   : > { %3009 = vrot.lane.b32.xlu1 %v3008_v35, %s3061_s9 }
 0x240   : > { %v2915_v53 = vpop.permute.xlu0 %2914 }
 0x241   : > { %v2917_v62 = vunpack.i.h.bf16 %v2915_v53  ;;  %v2916_v61 = vunpack.i.l.bf16 %v2915_v53 }
 0x243   : > { %v1721_v14 = vsel %vm813_vm4, %v1530_v42, %v2916_v61  ;;  %v1722_v18 = vsel %vm813_vm4, %v3765_v58, %v2917_v62 }
 0x244   : > { %v2920_v63 = vpop.permute.xlu0 %2919 }
 0x245   : > { %v2922_v12 = vunpack.i.h.bf16 %v2920_v63  ;;  %v2921_v54 = vunpack.i.l.bf16 %v2920_v63 }
 0x247   : > { %v1741_v31 = vsel %vm838_vm5, %v1721_v14, %v2921_v54  ;;  %v1742_v28 = vsel %vm838_vm5, %v1722_v18, %v2922_v12  ;;  %v1533_v18 = vsel %vm523_vm3, 0.0, %v1491_v40  ;;  %v1536_v40 = vsel %vm523_vm3, 0.0, %v1500_v56 }
 0x248   : > { %v4008_v60 = vpack.c.bf16 %v1742_v28, %v1741_v31  ;;  %v2925_v55 = vpop.permute.xlu0 %2924 }
 0x249   : > { %v2927_v22 = vunpack.i.h.bf16 %v2925_v55  ;;  %v2926_v3 = vunpack.i.l.bf16 %v2925_v55  ;;  %v2930_v46 = vpop.permute.xlu1 %2929 }
 0x24a   : > { %2601 = vmatprep.mubr.msk.bf16.mxu1 %vm885_vm6, %v4008_v60  ;;  %v2932_v21 = vunpack.i.h.bf16 %v2930_v46  ;;  %v2931_v49 = vunpack.i.l.bf16 %v2930_v46 }
 0x24b   : > { %v1725_v59 = vsel %vm813_vm4, %v1532_v23, %v2926_v3  ;;  %v1726_v29 = vsel %vm813_vm4, %v3834_v26, %v2927_v22 }
 0x24c   : > { %v2935_v19 = vpop.permute.xlu0 %2934  ;;  %v1723_v9 = vsel %vm813_vm4, %v1531_v16, %v2931_v49  ;;  %v1724_v26 = vsel %vm813_vm4, %v3913_v17, %v2932_v21  ;;  %v1534_v17 = vsel %vm523_vm3, 0.0, %v1494_v1  ;;  %v1535_v16 = vsel %vm523_vm3, 0.0, %v1497_v15 }
 0x24d   : > { %v2937_v47 = vunpack.i.h.bf16 %v2935_v19  ;;  %v2936_v58 = vunpack.i.l.bf16 %v2935_v19 }
 0x24f   : > { %v1745_v7 = vsel %vm838_vm5, %v1725_v59, %v2936_v58  ;;  %v1746_v36 = vsel %vm838_vm5, %v1726_v29, %v2937_v47  ;;  %v2940_v0 = vpop.permute.xlu1 %2939 }
 0x250   : > { %v4020_v45 = vpack.c.bf16 %v1746_v36, %v1745_v7  ;;  %v2942_v2 = vunpack.i.h.bf16 %v2940_v0  ;;  %v2941_v37 = vunpack.i.l.bf16 %v2940_v0  ;;  %v2945_v4 = vpop.permute.xlu0 %2944 }
 0x251   : > { %v2947_v43 = vunpack.i.h.bf16 %v2945_v4  ;;  %v2946_v35 = vunpack.i.l.bf16 %v2945_v4 }
 0x252   : > { %v1743_v30 = vsel %vm838_vm5, %v1723_v9, %v2941_v37  ;;  %v1744_v38 = vsel %vm838_vm5, %v1724_v26, %v2942_v2 }
 0x253   : > { %v4030_v44 = vpack.c.bf16 %v1744_v38, %v1743_v30  ;;  %v2950_v53 = vpop.permute.xlu1 %2949  ;;  %v1729_v12 = vsel %vm813_vm4, %v1534_v17, %v2946_v35  ;;  %v1730_v54 = vsel %vm813_vm4, %v3948_v34, %v2947_v43 }
 0x254   : > { %v2952_v61 = vunpack.i.h.bf16 %v2950_v53  ;;  %v2951_v63 = vunpack.i.l.bf16 %v2950_v53 }
 0x255   : > { %2602 = vmatmul.mubr.msk.bf16.vlgmr.msra.gmra.mrb[4].mxu1 %vm885_vm6, %v4030_v44 }
 0x256   : > { %2605 = vmatprep.mubr.msk.bf16.mxu1 %vm885_vm6, %v4020_v45  ;;  %2618 = vmatpush3.bf16.msra.mxu1 %v1912_v6  ;;  %v1727_v3 = vsel %vm813_vm4, %v1533_v18, %v2951_v63  ;;  %v1728_v34 = vsel %vm813_vm4, %v3959_v10, %v2952_v61  ;;  %v1537_v6 = vsel %vm523_vm3, 0.0, %v1503_v57 }
 0x257   : > { %v2955_v62 = vpop.permute.xlu0 %2954  ;;  %2733 = vmatprep.subr.msk.bf16.mxu1 %vm916_vm2, %v4037_v52 }
 0x258   : > { %v2957_v42 = vunpack.i.h.bf16 %v2955_v62  ;;  %v2956_v11 = vunpack.i.l.bf16 %v2955_v62 }
 0x25a   : > { %v1749_v27 = vsel %vm838_vm5, %v1729_v12, %v2956_v11  ;;  %v1750_v1 = vsel %vm838_vm5, %v1730_v54, %v2957_v42  ;;  %v2960_v14 = vpop.permute.xlu1 %2959 }
 0x25b   : > { %v4056_v31 = vpack.c.bf16 %v1750_v1, %v1749_v27  ;;  %v2962_v28 = vunpack.i.h.bf16 %v2960_v14  ;;  %v2961_v55 = vunpack.i.l.bf16 %v2960_v14  ;;  %v2965_v22 = vpop.permute.xlu0 %2964 }
 0x25c   : > { %v2967_v23 = vunpack.i.h.bf16 %v2965_v22  ;;  %v2966_v47 = vunpack.i.l.bf16 %v2965_v22 }
 0x25d   : > { %v1747_v46 = vsel %vm838_vm5, %v1727_v3, %v2961_v55  ;;  %v1748_v19 = vsel %vm838_vm5, %v1728_v34, %v2962_v28 }
 0x25e   : > { %v4063_v58 = vpack.c.bf16 %v1748_v19, %v1747_v46  ;;  %v2970_v20 = vpop.permute.xlu1 %2969  ;;  %v1733_v7 = vsel %vm813_vm4, %v1536_v40, %v2966_v47  ;;  %v1734_v36 = vsel %vm813_vm4, %v3968_v50, %v2967_v23 }
 0x25f   : > { %v2975_v59 = vpop.permute.xlu0 %2974  ;;  %v2972_v29 = vunpack.i.h.bf16 %v2970_v20  ;;  %v2971_v21 = vunpack.i.l.bf16 %v2970_v20 }
 0x260   : > { %2606 = vmatmul.mubr.msk.bf16.gmra.mrb[8].mxu1 %vm885_vm6, %v4063_v58  ;;  %v2977_v10 = vunpack.i.h.bf16 %v2975_v59  ;;  %v2976_v49 = vunpack.i.l.bf16 %v2975_v59  ;;  %v2023_v59 = vsel %vm916_vm2, %v4037_v52, 0 }
 0x261   : > { %2609 = vmatprep.mubr.msk.bf16.mxu1 %vm885_vm6, %v4056_v31  ;;  %v1731_v9 = vsel %vm813_vm4, %v1535_v16, %v2971_v21  ;;  %v1732_v50 = vsel %vm813_vm4, %v3973_v48, %v2972_v29 }
 0x262   : > { %v1753_v39 = vsel %vm838_vm5, %v1733_v7, %v2976_v49  ;;  %v1754_v56 = vsel %vm838_vm5, %v1734_v36, %v2977_v10  ;;  %v2980_v0 = vpop.permute.xlu1 %2979  ;;  %v2152_v49 = vunpack.c.h.bf16 %v2459_v25 }
 0x263   : > { %v1766_v2 = vpack.c.bf16 %v1754_v56, %v1753_v39  ;;  %v2982_v37 = vunpack.i.h.bf16 %v2980_v0  ;;  %v2981_v4 = vunpack.i.l.bf16 %v2980_v0  ;;  %v2995_v35 = vpop.permute.xlu0 %2994 }
 0x264   : > { %v2997_v62 = vunpack.i.h.bf16 %v2995_v35  ;;  %v2996_v61 = vunpack.i.l.bf16 %v2995_v35 }
 0x265   : > { %v1751_v26 = vsel %vm838_vm5, %v1731_v9, %v2981_v4  ;;  %v1752_v30 = vsel %vm838_vm5, %v1732_v50, %v2982_v37  ;;  %v2461_v9 = vld [vmem:[%s3187_s22 + $0x28] sm:$0xff] }
 0x266   : > { %v1765_v38 = vpack.c.bf16 %v1752_v30, %v1751_v26  ;;  %v2985_v43 = vpop.permute.xlu1 %2984  ;;  %v1720_v18 = vsel %vm813_vm4, %v3981_v13, %v2997_v62  ;;  %v1719_v28 = vsel %vm813_vm4, %v1529_v24, %v2996_v61  ;;  %v2460_v30 = vld [vmem:[%s3187_s22 + $0x20] sm:$0xff] }
 0x267   : > { %v2987_v51 = vunpack.i.h.bf16 %v2985_v43  ;;  %v2986_v53 = vunpack.i.l.bf16 %v2985_v43  ;;  %v3005_v11 = vpop.permute.xlu0 %3004 }
 0x268   : > { %2610 = vmatmul.mubr.msk.bf16.gmra.mrb[12].mxu1 %vm885_vm6, %v1765_v38  ;;  %v3007_v55 = vunpack.i.h.bf16 %v3005_v11 }
 0x269   : > { %2613 = vmatprep.mubr.msk.bf16.mxu1 %vm885_vm6, %v1766_v2  ;;  %v1735_v63 = vsel %vm813_vm4, %v1537_v6, %v2986_v53  ;;  %v1736_v42 = vsel %vm813_vm4, %v3986_v32, %v2987_v51  ;;  %v3006_v32 = vunpack.i.l.bf16 %v3005_v11  ;;  %v2155_v53 = vunpack.c.l.bf16 %v2461_v9 }
 0x26a   : > { %v2990_v15 = vpop.permute.xlu1 %2989  ;;  %v1738_v23 = vsel %vm813_vm4, %v3992_v33, %v3007_v55  ;;  %v2458_v33 = vld [vmem:[%s3187_s22 + $0x10] sm:$0xff] }
 0x26b   : > { %v2992_v17 = vunpack.i.h.bf16 %v2990_v15  ;;  %v2991_v48 = vunpack.i.l.bf16 %v2990_v15  ;;  %v1737_v13 = vsel %vm813_vm4, %v1538_v5, %v3006_v32  ;;  %v2150_v56 = vunpack.c.h.bf16 %v2458_v33 }
 0x26d   : > { %v1755_v12 = vsel %vm838_vm5, %v1735_v63, %v2991_v48  ;;  %v1756_v54 = vsel %vm838_vm5, %v1736_v42, %v2992_v17  ;;  %v2153_v48 = vunpack.c.l.bf16 %v2460_v30  ;;  %v2156_v42 = vunpack.c.h.bf16 %v2461_v9 }
 0x26e   : > { %v1767_v27 = vpack.c.bf16 %v1756_v54, %v1755_v12  ;;  %v3000_v1 = vpop.permute.xlu1 %2999 }
 0x26f   : > { %v3002_v57 = vunpack.i.h.bf16 %v3000_v1  ;;  %v3001_v14 = vunpack.i.l.bf16 %v3000_v1 }
 0x270   : > { %2614 = vmatmul.mubr.msk.bf16.gmra.mrb[16].mxu1 %vm885_vm6, %v1767_v27 }
 0x271   : > { %v1740_v22 = vsel %vm838_vm5, %v1720_v18, %v3002_v57  ;;  %v1739_v3 = vsel %vm838_vm5, %v1719_v28, %v3001_v14  ;;  %v2463_v28 = vld [vmem:[%s3187_s22 + $0x38] sm:$0xff] }
 0x272   : > { %v1759_v34 = vpack.c.bf16 %v1740_v22, %v1739_v3  ;;  %v3010_v46 = vpop.permute.xlu1 %3009  ;;  %v2462_v22 = vld [vmem:[%s3187_s22 + $0x30] sm:$0xff] }
 0x273   : > { %v3012_v8 = vunpack.i.h.bf16 %v3010_v46  ;;  %v3011_v19 = vunpack.i.l.bf16 %v3010_v46 }
 0x274   : > { %2619 = vmatprep.mubr.msk.bf16.mxu1 %vm885_vm6, %v1759_v34 }
 0x275   : > { %v1758_v47 = vsel %vm838_vm5, %v1738_v23, %v3012_v8  ;;  %v1757_v20 = vsel %vm838_vm5, %v1737_v13, %v3011_v19  ;;  %v2159_v8 = vunpack.c.l.bf16 %v2463_v28 }
 0x276   : > { %v1768_v40 = vpack.c.bf16 %v1758_v47, %v1757_v20  ;;  %v2157_v47 = vunpack.c.l.bf16 %v2462_v22 }
 0x278   : > { %2620 = vmatmul.mubr.msk.bf16.vlgmr.msra.gmra.mrb[4].mxu1 %vm885_vm6, %v4008_v60 }
 0x279   : > { %2636 = vmatpush3.bf16.msra.mxu1 %v2023_v59  ;;  %2623 = vmatprep.mubr.msk.bf16.mxu1 %vm885_vm6, %v4030_v44 }
 0x280   : > { %2624 = vmatmul.mubr.msk.bf16.gmra.mrb[8].mxu1 %vm885_vm6, %v4020_v45 }
 0x281   : > { %2627 = vmatprep.mubr.msk.bf16.mxu1 %vm885_vm6, %v4063_v58 }
 0x288   : > { %2628 = vmatmul.mubr.msk.bf16.gmra.mrb[12].mxu1 %vm885_vm6, %v4056_v31 }
 0x289   : > { %2631 = vmatprep.mubr.msk.bf16.mxu1 %vm885_vm6, %v1765_v38 }
 0x290   : > { %2632 = vmatmul.mubr.msk.bf16.gmra.mrb[16].mxu1 %vm885_vm6, %v1766_v2 }
 0x291   : > { %2637 = vmatprep.mubr.msk.bf16.mxu1 %vm885_vm6, %v4030_v44  ;;  %v2151_v44 = vunpack.c.l.bf16 %v2459_v25  ;;  %v2160_v25 = vunpack.c.h.bf16 %v2463_v28 }
 0x298   : > { %2638 = vmatmul.mubr.msk.bf16.vlgmr.msra.gmra.mrb[4].mxu1 %vm885_vm6, %v4020_v45  ;;  %v4149_v45 = vld [vmem:[%s4242_s6] ss:$0 sm:$0xff] }
 0x299   : > { %2641 = vmatprep.mubr.msk.bf16.mxu1 %vm885_vm6, %v4063_v58  ;;  %v2149_v58 = vunpack.c.l.bf16 %v2458_v33 }
 0x2a0   : > { %2642 = vmatmul.mubr.msk.bf16.gmra.mrb[8].mxu1 %vm885_vm6, %v4056_v31 }
 0x2a1   : > { %2645 = vmatprep.mubr.msk.bf16.mxu1 %vm885_vm6, %v1765_v38 }
 0x2a8   : > { %2646 = vmatmul.mubr.msk.bf16.gmra.mrb[12].mxu1 %vm885_vm6, %v1766_v2 }
 0x2a9   : > { %2649 = vmatprep.mubr.msk.bf16.mxu1 %vm885_vm6, %v1767_v27  ;;  %v2154_v27 = vunpack.c.h.bf16 %v2460_v30 }
 0x2b0   : > { %2650 = vmatmul.mubr.msk.bf16.gmra.mrb[16].mxu1 %vm885_vm6, %v1768_v40 }
 0x36b   : > { %v2639_v60 = vpop.f32.mrb[4].mxu1 }
 0x36c   : > { %v2174_v52 = vmul.f32 %v2639_v60, %v4143_v41  ;;  %v2059_v31 = vpop.f32.mrb[5].mxu1 }
 0x36d   : > { %v2172_v29 = vmul.f32 %v4143_v41, %v2059_v31  ;;  %v2640_v21 = vpop.f32.mrb[6].mxu1 }
 0x36e   : > { %v2197_v10 = vadd.f32 %v4149_v45, %v2174_v52  ;;  %v2175_v7 = vmul.f32 %v2640_v21, %v4143_v41  ;;  %v2062_v36 = vpop.f32.mrb[7].mxu1  ;;  %v2158_v52 = vunpack.c.h.bf16 %v2462_v22 }
 0x36f   : > { %v2195_v39 = vadd.f32 %v4149_v45, %v2172_v29  ;;  %v2173_v0 = vmul.f32 %v4143_v41, %v2062_v36 }
 0x370   : > { %v2213_v16 = vadd.f32 %v2197_v10, %v2151_v44  ;;  %v2198_v2 = vadd.f32 %v4149_v45, %v2175_v7 }
 0x371   : > { %v2211_v37 = vadd.f32 %v2195_v39, %v2149_v58  ;;  %v2196_v4 = vadd.f32 %v4149_v45, %v2173_v0  ;;  %v2464_v39 = vld [vmem:[%s3187_s22 + $0x40] sm:$0xff] }
 0x372   : > { %v2229_v50 = vmax.f32 %v2213_v16, 0.0  ;;  %v2214_v26 = vadd.f32 %v2198_v2, %v2152_v49  ;;  %v2465_v49 = vld [vmem:[%s3187_s22 + $0x48] sm:$0xff] }
 0x373   : > { %v2227_v38 = vmax.f32 %v2211_v37, 0.0  ;;  %v2212_v43 = vadd.f32 %v2196_v4, %v2150_v56  ;;  %v2643_v35 = vpop.f32.mrb[8].mxu1  ;;  %v2163_v37 = vunpack.c.l.bf16 %v2465_v49 }
 0x374   : > { %2245 = vst.msk [vmem:[%s3147_s20 + $0x10] sm:$0xff] %vm813_vm4, %v2229_v50  ;;  %v2230_v51 = vmax.f32 %v2214_v26, 0.0  ;;  %v2178_v15 = vmul.f32 %v2643_v35, %v4143_v41  ;;  %v2075_v6 = vpop.f32.mrb[9].mxu1  ;;  %v2161_v26 = vunpack.c.l.bf16 %v2464_v39  ;;  %v2164_v35 = vunpack.c.h.bf16 %v2465_v49 }
 0x375   : > { %2243 = vst.msk [vmem:[%s3147_s20] sm:$0xff] %vm813_vm4, %v2227_v38  ;;  %v2228_v17 = vmax.f32 %v2212_v43, 0.0  ;;  %v2176_v62 = vmul.f32 %v4143_v41, %v2075_v6  ;;  %v2644_v61 = vpop.f32.mrb[10].mxu1  ;;  %v2162_v6 = vunpack.c.h.bf16 %v2464_v39 }
 0x376   : > { %2246 = vst.msk [vmem:[%s3147_s20 + $0x18] sm:$0xff] %vm813_vm4, %v2230_v51  ;;  %v2201_v63 = vadd.f32 %v4149_v45, %v2178_v15  ;;  %v2179_v11 = vmul.f32 %v2644_v61, %v4143_v41  ;;  %v2078_v12 = vpop.f32.mrb[11].mxu1 }
 0x377   : > { %2244 = vst.msk [vmem:[%s3147_s20 + $0x8] sm:$0xff] %vm813_vm4, %v2228_v17  ;;  %v2199_v54 = vadd.f32 %v4149_v45, %v2176_v62  ;;  %v2177_v1 = vmul.f32 %v4143_v41, %v2078_v12 }
 0x378   : > { %v2217_v24 = vadd.f32 %v2201_v63, %v2155_v53  ;;  %v2202_v57 = vadd.f32 %v4149_v45, %v2179_v11 }
 0x379   : > { %v2215_v14 = vadd.f32 %v2199_v54, %v2153_v48  ;;  %v2200_v18 = vadd.f32 %v4149_v45, %v2177_v1 }
 0x37a   : > { %v2233_v55 = vmax.f32 %v2217_v24, 0.0  ;;  %v2218_v32 = vadd.f32 %v2202_v57, %v2156_v42 }
 0x37b   : > { %v2231_v3 = vmax.f32 %v2215_v14, 0.0  ;;  %v2216_v34 = vadd.f32 %v2200_v18, %v2154_v27  ;;  %v2647_v46 = vpop.f32.mrb[12].mxu1 }
 0x37c   : > { %2249 = vst.msk [vmem:[%s3147_s20 + $0x30] sm:$0xff] %vm813_vm4, %v2233_v55  ;;  %v2234_v5 = vmax.f32 %v2218_v32, 0.0  ;;  %v2182_v19 = vmul.f32 %v2647_v46, %v4143_v41  ;;  %v2091_v13 = vpop.f32.mrb[13].mxu1 }
 0x37d   : > { %2247 = vst.msk [vmem:[%s3147_s20 + $0x20] sm:$0xff] %vm813_vm4, %v2231_v3  ;;  %v2232_v23 = vmax.f32 %v2216_v34, 0.0  ;;  %v2180_v20 = vmul.f32 %v4143_v41, %v2091_v13  ;;  %v2648_v40 = vpop.f32.mrb[14].mxu1 }
 0x37e   : > { %2250 = vst.msk [vmem:[%s3147_s20 + $0x38] sm:$0xff] %vm813_vm4, %v2234_v5  ;;  %v2205_v59 = vadd.f32 %v4149_v45, %v2182_v19  ;;  %v2183_v33 = vmul.f32 %v2648_v40, %v4143_v41  ;;  %v2094_v60 = vpop.f32.mrb[15].mxu1 }
 0x37f   : > { %2248 = vst.msk [vmem:[%s3147_s20 + $0x28] sm:$0xff] %vm813_vm4, %v2232_v23  ;;  %v2203_v44 = vadd.f32 %v4149_v45, %v2180_v20  ;;  %v2181_v31 = vmul.f32 %v4143_v41, %v2094_v60 }
 0x380   : > { %v2221_v58 = vadd.f32 %v2205_v59, %v2159_v8  ;;  %v2206_v29 = vadd.f32 %v4149_v45, %v2183_v33 }
 0x381   : > { %v2219_v21 = vadd.f32 %v2203_v44, %v2157_v47  ;;  %v2204_v10 = vadd.f32 %v4149_v45, %v2181_v31 }
 0x382   : > { %v2237_v7 = vmax.f32 %v2221_v58, 0.0  ;;  %v2222_v36 = vadd.f32 %v2206_v29, %v2160_v25 }
 0x383   : > { %v2235_v56 = vmax.f32 %v2219_v21, 0.0  ;;  %v2220_v0 = vadd.f32 %v2204_v10, %v2158_v52  ;;  %v2651_v16 = vpop.f32.mrb[16].mxu1 }
 0x384   : > { %2253 = vst.msk [vmem:[%s3147_s20 + $0x50] sm:$0xff] %vm813_vm4, %v2237_v7  ;;  %v2238_v2 = vmax.f32 %v2222_v36, 0.0  ;;  %v2186_v4 = vmul.f32 %v2651_v16, %v4143_v41  ;;  %v2107_v9 = vpop.f32.mrb[17].mxu1 }
 0x385   : > { %2251 = vst.msk [vmem:[%s3147_s20 + $0x40] sm:$0xff] %vm813_vm4, %v2235_v56  ;;  %v2236_v50 = vmax.f32 %v2220_v0, 0.0  ;;  %v2184_v30 = vmul.f32 %v4143_v41, %v2107_v9  ;;  %v2652_v38 = vpop.f32.mrb[18].mxu1 }
 0x386   : > { %2254 = vst.msk [vmem:[%s3147_s20 + $0x58] sm:$0xff] %vm813_vm4, %v2238_v2  ;;  %v2209_v43 = vadd.f32 %v4149_v45, %v2186_v4  ;;  %v2187_v51 = vmul.f32 %v2652_v38, %v4143_v41  ;;  %v2110_v53 = vpop.f32.mrb[19].mxu1 }
 0x387   : > { %2252 = vst.msk [vmem:[%s3147_s20 + $0x48] sm:$0xff] %vm813_vm4, %v2236_v50  ;;  %v2207_v15 = vadd.f32 %v4149_v45, %v2184_v30  ;;  %v2185_v17 = vmul.f32 %v4143_v41, %v2110_v53 }
 0x388   : > { %v2225_v48 = vadd.f32 %v2209_v43, %v2163_v37  ;;  %v2210_v62 = vadd.f32 %v4149_v45, %v2187_v51 }
 0x389   : > { %v2223_v61 = vadd.f32 %v2207_v15, %v2161_v26  ;;  %v2208_v63 = vadd.f32 %v4149_v45, %v2185_v17 }
 0x38a   : > { %v2241_v42 = vmax.f32 %v2225_v48, 0.0  ;;  %v2226_v11 = vadd.f32 %v2210_v62, %v2164_v35 }
 0x38b   : > { %v2239_v12 = vmax.f32 %v2223_v61, 0.0  ;;  %v2224_v54 = vadd.f32 %v2208_v63, %v2162_v6 }
 0x38c   : > { %2257 = vst.msk [vmem:[%s3147_s20 + $0x70] sm:$0xff] %vm813_vm4, %v2241_v42  ;;  %v2242_v27 = vmax.f32 %v2226_v11, 0.0 }
 0x38d   : > { %2255 = vst.msk [vmem:[%s3147_s20 + $0x60] sm:$0xff] %vm813_vm4, %v2239_v12  ;;  %v2240_v1 = vmax.f32 %v2224_v54, 0.0 }
 0x38e   : > { %2258 = vst.msk [vmem:[%s3147_s20 + $0x78] sm:$0xff] %vm813_vm4, %v2242_v27 }
 0x38f   : > { %2256 = vst.msk [vmem:[%s3147_s20 + $0x68] sm:$0xff] %vm813_vm4, %v2240_v1 }
 0x390 PF: > { %s17_s28 = sadd.s32 1, %s3057_s28   ;;  %s4260_s24 = smov %s3049_s26 }
 0x391   : > { %p14_p8 = scmp.ge.s32.totalorder %s17_s28, 6   ;;  %s4261_s25 = smov %s3053_s27 }
 0x392   : > { %s4262_s26 = smov %s4265_s29  ;;  %s4263_s27 = smov %s4269_s30 }
 0x393   :  { %16 = sbr.rel (!%p14_p8) target bundleno = 3 (0x3), region = 90 }

</bundles_post_ra>
